<compile_context>
chip_gen: v7x
topology: tpu7x:2x2x1
jax: 0.10.0
libtpu: 0.0.40
codegen_flags: <defaults>
</compile_context>

<pallas_src>
import math
import jax
import jax.numpy as jnp
from jax.experimental import pallas as pl
from jax.experimental.pallas import tpu as pltpu

# Raised scoped-VMEM limit: big resident weight tiles, but <= 48 MiB for v7x headroom.
VMEM_LIMIT = 48 * 1024 * 1024


# ------------------------------ helpers ------------------------------------

def _round_up(x, m):
    return ((x + m - 1) // m) * m


def _pad_rows(x, rows):
    pad = rows - x.shape[0]
    return jnp.pad(x, ((0, pad), (0, 0))) if pad else x


# --------------------- fused LayerNorm + Linear (+gelu/residual) ------------

def _make_linear_kernel(has_ln, act_gelu, has_res):
    c = math.sqrt(2.0 / math.pi)

    def kernel(*refs):
        x_ref, w_ref, b_ref = refs[0], refs[1], refs[2]
        idx = 3
        if has_ln:
            g_ref, be_ref = refs[idx], refs[idx + 1]
            idx += 2
        if has_res:
            r_ref = refs[idx]
            idx += 1
        o_ref = refs[idx]

        if has_ln:                                       # fused LN prologue (f32)
            x = x_ref[...].astype(jnp.float32)
            mu = jnp.mean(x, axis=-1, keepdims=True)
            var = jnp.mean((x - mu) ** 2, axis=-1, keepdims=True)
            x = (x - mu) * jax.lax.rsqrt(var + 1e-5) * g_ref[...] + be_ref[...]
            x = x.astype(jnp.bfloat16)
        else:
            x = x_ref[...]                               # already bf16

        acc = jnp.dot(x, w_ref[...], preferred_element_type=jnp.float32)  # bf16 MXU
        acc = acc + b_ref[...]
        if act_gelu:                                     # GPT-2 "gelu_new" (EUP tanh)
            acc = 0.5 * acc * (1.0 + jnp.tanh(c * (acc + 0.044715 * acc ** 3)))
        if has_res:                                      # fused residual add (f32)
            acc = acc + r_ref[...].astype(jnp.float32)
        o_ref[...] = acc.astype(o_ref.dtype)             # bf16 writeback

    return kernel


def fused_linear(x, w, b, *, ln=None, act_gelu=False, residual=None, tm=512):
    """x:(M,K) bf16, w:(K,N) bf16, b:(1,N) f32 -> (M,N) bf16.
    1-D grid over token tiles; the full (K,N) weight / bias / LN params stay
    resident (constant block index), so x is read and LayerNorm'd exactly once."""
    M, K = x.shape
    _, N = w.shape
    tm = min(tm, _round_up(M, 8))
    Mp = _round_up(M, tm)
    xp = _pad_rows(x, Mp)
    rp = _pad_rows(residual, Mp) if residual is not None else None

    in_specs = [
        pl.BlockSpec((tm, K), lambda i: (i, 0)),
        pl.BlockSpec((K, N), lambda i: (0, 0)),          # resident across token tiles
        pl.BlockSpec((1, N), lambda i: (0, 0)),
    ]
    args = [xp, w, b]
    if ln is not None:
        in_specs += [pl.BlockSpec((1, K), lambda i: (0, 0)),
                     pl.BlockSpec((1, K), lambda i: (0, 0))]
        args += [ln[0], ln[1]]
    if residual is not None:
        in_specs.append(pl.BlockSpec((tm, N), lambda i: (i, 0)))
        args.append(rp)

    out = pl.pallas_call(
        _make_linear_kernel(ln is not None, act_gelu, residual is not None),
        grid=(Mp // tm,),
        in_specs=in_specs,
        out_specs=pl.BlockSpec((tm, N), lambda i: (i, 0)),
        out_shape=jax.ShapeDtypeStruct((Mp, N), jnp.bfloat16),
        compiler_params=pltpu.CompilerParams(
            dimension_semantics=("parallel",),
            vmem_limit_bytes=VMEM_LIMIT),
    )(*args)
    return out[:M] if Mp != M else out


# ----------------------------- causal attention ------------------------------

def _make_attn_kernel(hp, hd, S):
    scale = 1.0 / math.sqrt(hd)

    def kernel(q_ref, k_ref, v_ref, o_ref):
        qb = q_ref[0]                                    # (S, hp*hd) bf16
        kb = k_ref[0]
        vb = v_ref[0]
        row = jax.lax.broadcasted_iota(jnp.int32, (S, S), 0)
        col = jax.lax.broadcasted_iota(jnp.int32, (S, S), 1)
        causal = col <= row
        outs = []
        # TODO(synk): flash-style KV tiling (online softmax) for S >= ~1024;
        # per-head (S,S) scores are held in vregs/VMEM here.
        for p in range(hp):                              # static loop, hp <= 4
            lo, hi = p * hd, (p + 1) * hd
            qh = qb[:, lo:hi] * scale                    # bf16; 1/sqrt(hd) folded into q
            kh = kb[:, lo:hi]
            vh = vb[:, lo:hi]
            s = jax.lax.dot_general(qh, kh, (((1,), (1,)), ((), ())),
                                    preferred_element_type=jnp.float32)
            s = jnp.where(causal, s, jnp.float32(-1e30))
            s = s - jnp.max(s, axis=-1, keepdims=True)
            e = jnp.exp(s)
            pn = e / jnp.sum(e, axis=-1, keepdims=True)
            outs.append(jnp.dot(pn.astype(jnp.bfloat16), vh,
                                preferred_element_type=jnp.float32))
        # single lane-dense full-width store instead of hp sub-128-lane stores
        o_ref[0] = jnp.concatenate(outs, axis=-1).astype(jnp.bfloat16)

    return kernel


def causal_attention(qkv, n_head, hd):
    """qkv: (B, S, 3D) bf16 -> (B, S, D) bf16.  Heads are sliced directly out of
    the packed qkv layout via BlockSpec index maps (no JAX transposes); several
    heads are packed per grid step so the lane dim is >= 128 where possible."""
    B, S, threeD = qkv.shape
    D = threeD // 3
    H = n_head
    hp = max(1, min(H, 128 // max(hd, 1)))
    while H % hp:
        hp -= 1
    G = H // hp
    blk = hp * hd

    def spec(off):
        return pl.BlockSpec((1, S, blk), lambda b, g, off=off: (b, 0, off + g))

    return pl.pallas_call(
        _make_attn_kernel(hp, hd, S),
        grid=(B, G),
        in_specs=[spec(0), spec(G), spec(2 * G)],        # q / k / v regions of qkv
        out_specs=pl.BlockSpec((1, S, blk), lambda b, g: (b, 0, g)),
        out_shape=jax.ShapeDtypeStruct((B, S, D), jnp.bfloat16),
        compiler_params=pltpu.CompilerParams(
            dimension_semantics=("parallel", "parallel"),
            vmem_limit_bytes=VMEM_LIMIT),
    )(qkv, qkv, qkv)


# -------------------- fused final-LN + tied LM head + CE ---------------------

def _make_head_ce_kernel(v_real):
    def kernel(x_ref, wT_ref, g_ref, b_ref, lab_ref,
               logits_ref, loss_ref,
               xln_ref, m_s, l_s, t_s):
        v = pl.program_id(1)
        nv = pl.num_programs(1)

        @pl.when(v == 0)
        def _():
            x = x_ref[...].astype(jnp.float32)           # (tm, D)
            mu = jnp.mean(x, axis=-1, keepdims=True)
            var = jnp.mean((x - mu) ** 2, axis=-1, keepdims=True)
            xn = (x - mu) * jax.lax.rsqrt(var + 1e-5) * g_ref[...] + b_ref[...]
            xln_ref[...] = xn.astype(jnp.bfloat16)       # cache LN'd tile once
            m_s[...] = jnp.full_like(m_s, -jnp.inf)
            l_s[...] = jnp.zeros_like(l_s)
            t_s[...] = jnp.zeros_like(t_s)

        # tied head with pre-transposed wte^T: plain (tm,D)@(D,tv), no XLU transpose
        blk = jnp.dot(xln_ref[...], wT_ref[...],
                      preferred_element_type=jnp.float32)          # (tm, tv) f32
        logits_ref[...] = blk.astype(logits_ref.dtype)             # bf16 write-once

        labels = lab_ref[...]                                      # (tm, 1) int32
        tm, tv = blk.shape
        col = jax.lax.broadcasted_iota(jnp.int32, (tm, tv), 1) + v * tv
        in_vocab = col < v_real
        blk_m = jnp.where(in_vocab, blk, -jnp.inf)                 # mask padded vocab

        new_max = jnp.maximum(m_s[...], jnp.max(blk_m, axis=-1, keepdims=True))
        l_s[...] = (l_s[...] * jnp.exp(m_s[...] - new_max)
                    + jnp.sum(jnp.exp(blk_m - new_max), axis=-1, keepdims=True))
        t_s[...] = t_s[...] + jnp.sum(jnp.where(col == labels, blk, 0.0),
                                      axis=-1, keepdims=True)
        m_s[...] = new_max

        @pl.when(v == nv - 1)
        def _():
            valid = (labels != -100).astype(jnp.float32)           # ignore_index=-100
            loss_ref[...] = (m_s[...] + jnp.log(l_s[...]) - t_s[...]) * valid

    return kernel


def lm_head_ce(h, wte, ln_g, ln_b, targets, *, tm=256, tv=512):
    """h:(N,D) bf16, wte:(V,D) bf16 (tied embedding), targets:(N,1) int32.
    Returns (logits (N,V) bf16, per-row CE loss (N,1) f32, 0 for ignored rows).
    N and V are padded to tile multiples; padded vocab columns are masked out of
    the online logsumexp and padded rows carry label -100."""
    N, D = h.shape
    V, _ = wte.shape
    tm = min(tm, _round_up(N, 8))
    Np = _round_up(N, tm)
    tv = min(tv, _round_up(V, 128))
    Vp = _round_up(V, tv)

    hp_ = _pad_rows(h, Np)
    tp = (jnp.pad(targets, ((0, Np - N), (0, 0)), constant_values=-100)
          if Np != N else targets)
    # One-time pre-transpose + pad of the tied LM head so the in-kernel dot
    # needs no per-vocab-tile XLU transpose (flagged as a v6e/v7x XLU hazard).
    wte_T = jnp.pad(wte.T, ((0, 0), (0, Vp - V)))

    grid = (Np // tm, Vp // tv)          # vocab axis innermost (online logsumexp)

    logits, loss_rows = pl.pallas_call(
        _make_head_ce_kernel(V),
        grid=grid,
        in_specs=[
            pl.BlockSpec((tm, D), lambda m, v: (m, 0)),   # resident across v
            pl.BlockSpec((D, tv), lambda m, v: (0, v)),   # wte^T columns stream
            pl.BlockSpec((1, D), lambda m, v: (0, 0)),
            pl.BlockSpec((1, D), lambda m, v: (0, 0)),
            pl.BlockSpec((tm, 1), lambda m, v: (m, 0)),
        ],
        out_specs=[
            pl.BlockSpec((tm, tv), lambda m, v: (m, v)),
            pl.BlockSpec((tm, 1), lambda m, v: (m, 0)),
        ],
        out_shape=[
            jax.ShapeDtypeStruct((Np, Vp), jnp.bfloat16),  # bf16 logits writeback
            jax.ShapeDtypeStruct((Np, 1), jnp.float32),
        ],
        scratch_shapes=[
            pltpu.VMEM((tm, D), jnp.bfloat16),             # cached LN(h) tile
            pltpu.VMEM((tm, 1), jnp.float32),              # running max
            pltpu.VMEM((tm, 1), jnp.float32),              # running sum-exp
            pltpu.VMEM((tm, 1), jnp.float32),              # target logit
        ],
        compiler_params=pltpu.CompilerParams(
            dimension_semantics=("parallel", "arbitrary"),
            vmem_limit_bytes=VMEM_LIMIT),
    )(hp_, wte_T, ln_g, ln_b, tp)
    return logits[:N, :V], loss_rows[:N]


# ------------------------------ model (glue) -------------------------------

def init_params(key, vocab, n_pos, d, n_layer):
    std = 0.02
    ks = jax.random.split(key, 2 + n_layer)

    def wgt(k, shape):
        return (jax.random.normal(k, shape) * std).astype(jnp.bfloat16)

    params = {
        "wte": wgt(ks[0], (vocab, d)),                    # bf16 (embedding + tied head)
        "wpe": (jax.random.normal(ks[1], (n_pos, d)) * std).astype(jnp.float32),
        "ln_f_g": jnp.ones((1, d), jnp.float32),
        "ln_f_b": jnp.zeros((1, d), jnp.float32),
        "blocks": [],
    }
    for l in range(n_layer):
        bk = jax.random.split(ks[2 + l], 4)
        params["blocks"].append({
            "ln1_g": jnp.ones((1, d), jnp.float32),
            "ln1_b": jnp.zeros((1, d), jnp.float32),
            "attn_w": wgt(bk[0], (d, 3 * d)),
            "attn_b": jnp.zeros((1, 3 * d), jnp.float32),
            "proj_w": wgt(bk[1], (d, d)),
            "proj_b": jnp.zeros((1, d), jnp.float32),
            "ln2_g": jnp.ones((1, d), jnp.float32),
            "ln2_b": jnp.zeros((1, d), jnp.float32),
            "fc_w": wgt(bk[2], (d, 4 * d)),
            "fc_b": jnp.zeros((1, 4 * d), jnp.float32),
            "mlp_proj_w": wgt(bk[3], (4 * d, d)),
            "mlp_proj_b": jnp.zeros((1, d), jnp.float32),
        })
    return params


def cagm_forward(params, input_ids, labels, n_head):
    """Equivalent of CAGM.forward(inputs, labels) -> (loss, logits)."""
    B, S = input_ids.shape
    d = params["wpe"].shape[1]
    hd = d // n_head

    # embedding lookup + positional embedding (glue: gather); residual stream bf16
    h = (params["wte"][input_ids].astype(jnp.float32)
         + params["wpe"][:S][None, :, :]).astype(jnp.bfloat16)
    h = h.reshape(B * S, d)

    for blk in params["blocks"]:
        # --- attention sub-block (LN1 fused into the QKV matmul) ---
        qkv = fused_linear(h, blk["attn_w"], blk["attn_b"],
                           ln=(blk["ln1_g"], blk["ln1_b"]))            # (B*S, 3d) bf16
        attn = causal_attention(qkv.reshape(B, S, 3 * d), n_head, hd)  # (B, S, d) bf16
        h = fused_linear(attn.reshape(B * S, d), blk["proj_w"], blk["proj_b"],
                         residual=h)                                   # bias+residual fused

        # --- MLP sub-block (LN2 + gelu fused into fc, residual fused into proj) ---
        a = fused_linear(h, blk["fc_w"], blk["fc_b"],
                         ln=(blk["ln2_g"], blk["ln2_b"]), act_gelu=True)  # bf16 (M,4d)
        h = fused_linear(a, blk["mlp_proj_w"], blk["mlp_proj_b"], residual=h)

    # shifted CE targets: target[b, s] = labels[b, s+1], last position ignored (-100)
    tgt = jnp.concatenate(
        [labels[:, 1:], jnp.full((B, 1), -100, labels.dtype)], axis=1
    ).astype(jnp.int32).reshape(B * S, 1)

    logits, loss_rows = lm_head_ce(h, params["wte"],
                                   params["ln_f_g"], params["ln_f_b"], tgt)
    valid = (tgt != -100).astype(jnp.float32)
    loss = jnp.sum(loss_rows) / jnp.maximum(jnp.sum(valid), 1.0)
    return loss, logits.reshape(B, S, -1)


# ---------------------------------- main ------------------------------------

if __name__ == "__main__":
    VOCAB = 640       # NOT a multiple of the vocab tile -> exercises pad/mask path
    N_POS = 8
    D = 128
    N_HEAD = 4        # head_dim = 32; 4 heads packed per attention grid step (128 lanes)
    N_LAYER = 2
    B, S = 2, 8

    key = jax.random.PRNGKey(0)
    pkey, ikey = jax.random.split(key)
    params = init_params(pkey, VOCAB, N_POS, D, N_LAYER)

    input_ids = jax.random.randint(ikey, (B, S), 0, VOCAB, dtype=jnp.int32)
    labels = input_ids  # standard LM setup: labels == inputs

    loss, logits = jax.jit(cagm_forward, static_argnames="n_head")(
        params, input_ids, labels, n_head=N_HEAD)
    jax.block_until_ready((loss, logits))

    assert logits.shape == (B, S, VOCAB)
    assert bool(jnp.isfinite(loss))
    print("KERNEL_OK")
</pallas_src>

<mosaic_0001>
module attributes {stable_mosaic.version = 11 : i64} {
  func.func @kernel(%arg0: i32, %arg1: memref<16x128xbf16, #tpu.memory_space<vmem>>, %arg2: memref<128x384xbf16, #tpu.memory_space<vmem>>, %arg3: memref<1x384xf32, #tpu.memory_space<vmem>>, %arg4: memref<1x128xf32, #tpu.memory_space<vmem>>, %arg5: memref<1x128xf32, #tpu.memory_space<vmem>>, %arg6: memref<16x384xbf16, #tpu.memory_space<vmem>>) attributes {dimension_semantics = [#tpu.dimension_semantics<parallel>], iteration_bounds = array<i64: 1>, scalar_prefetch = 0 : i64, scratch_operands = 0 : i64, tpu.core_type = #tpu.core_type<tc>, window_params = [{transform_indices = @transform_0, window_bounds = array<i64: 16, 128>}, {pipeline_mode = #tpu.pipeline_mode<synchronous>, transform_indices = @transform_1, window_bounds = array<i64: 128, 384>}, {pipeline_mode = #tpu.pipeline_mode<synchronous>, transform_indices = @transform_2, window_bounds = array<i64: 1, 384>}, {pipeline_mode = #tpu.pipeline_mode<synchronous>, transform_indices = @transform_3, window_bounds = array<i64: 1, 128>}, {pipeline_mode = #tpu.pipeline_mode<synchronous>, transform_indices = @transform_4, window_bounds = array<i64: 1, 128>}, {transform_indices = @transform_5, window_bounds = array<i64: 16, 384>}]} {
    %c0 = arith.constant 0 : index
    %c0_0 = arith.constant 0 : index
    %0 = vector.load %arg1[%c0, %c0_0] : memref<16x128xbf16, #tpu.memory_space<vmem>>, vector<16x128xbf16>
    %1 = arith.extf %0 : vector<16x128xbf16> to vector<16x128xf32>
    %cst = arith.constant dense<0.000000e+00> : vector<16xf32>
    %2 = vector.multi_reduction <add>, %1, %cst [1] : vector<16x128xf32> to vector<16xf32>
    %3 = vector.shape_cast %2 : vector<16xf32> to vector<16x1xf32>
    %cst_1 = arith.constant 1.280000e+02 : f32
    %4 = vector.broadcast %cst_1 : f32 to vector<16x1xf32>
    %5 = arith.divf %3, %4 : vector<16x1xf32>
    %6 = vector.broadcast %5 : vector<16x1xf32> to vector<16x128xf32>
    %7 = arith.subf %1, %6 : vector<16x128xf32>
    %8 = arith.mulf %7, %7 : vector<16x128xf32>
    %cst_2 = arith.constant dense<0.000000e+00> : vector<16xf32>
    %9 = vector.multi_reduction <add>, %8, %cst_2 [1] : vector<16x128xf32> to vector<16xf32>
    %10 = vector.shape_cast %9 : vector<16xf32> to vector<16x1xf32>
    %cst_3 = arith.constant 1.280000e+02 : f32
    %11 = vector.broadcast %cst_3 : f32 to vector<16x1xf32>
    %12 = arith.divf %10, %11 : vector<16x1xf32>
    %13 = vector.broadcast %5 : vector<16x1xf32> to vector<16x128xf32>
    %14 = arith.subf %1, %13 : vector<16x128xf32>
    %cst_4 = arith.constant 9.99999974E-6 : f32
    %15 = vector.broadcast %cst_4 : f32 to vector<16x1xf32>
    %16 = arith.addf %12, %15 : vector<16x1xf32>
    %17 = math.rsqrt %16 : vector<16x1xf32>
    %18 = vector.broadcast %17 : vector<16x1xf32> to vector<16x128xf32>
    %19 = arith.mulf %14, %18 : vector<16x128xf32>
    %c0_5 = arith.constant 0 : index
    %c0_6 = arith.constant 0 : index
    %20 = vector.load %arg4[%c0_5, %c0_6] : memref<1x128xf32, #tpu.memory_space<vmem>>, vector<1x128xf32>
    %21 = vector.broadcast %20 : vector<1x128xf32> to vector<16x128xf32>
    %22 = arith.mulf %19, %21 : vector<16x128xf32>
    %c0_7 = arith.constant 0 : index
    %c0_8 = arith.constant 0 : index
    %23 = vector.load %arg5[%c0_7, %c0_8] : memref<1x128xf32, #tpu.memory_space<vmem>>, vector<1x128xf32>
    %24 = vector.broadcast %23 : vector<1x128xf32> to vector<16x128xf32>
    %25 = arith.addf %22, %24 : vector<16x128xf32>
    %26 = arith.truncf %25 : vector<16x128xf32> to vector<16x128xbf16>
    %c0_9 = arith.constant 0 : index
    %c0_10 = arith.constant 0 : index
    %27 = vector.load %arg2[%c0_9, %c0_10] : memref<128x384xbf16, #tpu.memory_space<vmem>>, vector<128x384xbf16>
    %cst_11 = arith.constant dense<0.000000e+00> : vector<16x384xf32>
    %28 = tpu.matmul %26, %27, %cst_11 {dimension_numbers = #tpu.dot_dimension_numbers<[1], [0], [0], [1], [0, 0, 1, 1], [], []>} : vector<16x128xbf16>, vector<128x384xbf16>, vector<16x384xf32> -> vector<16x384xf32>
    %c0_12 = arith.constant 0 : index
    %c0_13 = arith.constant 0 : index
    %29 = vector.load %arg3[%c0_12, %c0_13] : memref<1x384xf32, #tpu.memory_space<vmem>>, vector<1x384xf32>
    %30 = vector.broadcast %29 : vector<1x384xf32> to vector<16x384xf32>
    %31 = arith.addf %28, %30 : vector<16x384xf32>
    %32 = arith.truncf %31 : vector<16x384xf32> to vector<16x384xbf16>
    %c0_14 = arith.constant 0 : index
    %c0_15 = arith.constant 0 : index
    %33 = vector.load %arg6[%c0_14, %c0_15] : memref<16x384xbf16, #tpu.memory_space<vmem>>, vector<16x384xbf16>
    tpu.vector_store %arg6[%c0_14, %c0_15], %32 {strides = array<i32>} : memref<16x384xbf16, #tpu.memory_space<vmem>>, vector<16x384xbf16>,
    return
  }
  func.func @transform_0(%arg0: i32) -> (i32, i32) {
    %c0_i32 = arith.constant 0 : i32
    %c0_i32_0 = arith.constant 0 : i32
    return %arg0, %c0_i32 : i32, i32
  }
  func.func @transform_1(%arg0: i32) -> (i32, i32) {
    %c0_i32 = arith.constant 0 : i32
    %c0_i32_0 = arith.constant 0 : i32
    %c0_i32_1 = arith.constant 0 : i32
    return %c0_i32, %c0_i32_0 : i32, i32
  }
  func.func @transform_2(%arg0: i32) -> (i32, i32) {
    %c0_i32 = arith.constant 0 : i32
    %c0_i32_0 = arith.constant 0 : i32
    %c0_i32_1 = arith.constant 0 : i32
    return %c0_i32, %c0_i32_0 : i32, i32
  }
  func.func @transform_3(%arg0: i32) -> (i32, i32) {
    %c0_i32 = arith.constant 0 : i32
    %c0_i32_0 = arith.constant 0 : i32
    %c0_i32_1 = arith.constant 0 : i32
    return %c0_i32, %c0_i32_0 : i32, i32
  }
  func.func @transform_4(%arg0: i32) -> (i32, i32) {
    %c0_i32 = arith.constant 0 : i32
    %c0_i32_0 = arith.constant 0 : i32
    %c0_i32_1 = arith.constant 0 : i32
    return %c0_i32, %c0_i32_0 : i32, i32
  }
  func.func @transform_5(%arg0: i32) -> (i32, i32) {
    %c0_i32 = arith.constant 0 : i32
    %c0_i32_0 = arith.constant 0 : i32
    return %arg0, %c0_i32 : i32, i32
  }
}

module attributes {stable_mosaic.version = 11 : i64} {
  func.func @kernel(%arg0: i32, %arg1: i32, %arg2: memref<1x8x128xbf16, #tpu.memory_space<vmem>>, %arg3: memref<1x8x128xbf16, #tpu.memory_space<vmem>>, %arg4: memref<1x8x128xbf16, #tpu.memory_space<vmem>>, %arg5: memref<1x8x128xbf16, #tpu.memory_space<vmem>>) attributes {dimension_semantics = [#tpu.dimension_semantics<parallel>, #tpu.dimension_semantics<parallel>], iteration_bounds = array<i64: 2, 1>, scalar_prefetch = 0 : i64, scratch_operands = 0 : i64, tpu.core_type = #tpu.core_type<tc>, window_params = [{transform_indices = @transform_0, window_bounds = array<i64: 1, 8, 128>}, {transform_indices = @transform_1, window_bounds = array<i64: 1, 8, 128>}, {transform_indices = @transform_2, window_bounds = array<i64: 1, 8, 128>}, {transform_indices = @transform_3, window_bounds = array<i64: 1, 8, 128>}]} {
    %c0 = arith.constant 0 : index
    %c0_0 = arith.constant 0 : index
    %c0_1 = arith.constant 0 : index
    %0 = vector.load %arg2[%c0, %c0_0, %c0_1] : memref<1x8x128xbf16, #tpu.memory_space<vmem>>, vector<1x8x128xbf16>
    %1 = vector.shape_cast %0 : vector<1x8x128xbf16> to vector<8x128xbf16>
    %c0_2 = arith.constant 0 : index
    %c0_3 = arith.constant 0 : index
    %c0_4 = arith.constant 0 : index
    %2 = vector.load %arg3[%c0_2, %c0_3, %c0_4] : memref<1x8x128xbf16, #tpu.memory_space<vmem>>, vector<1x8x128xbf16>
    %3 = vector.shape_cast %2 : vector<1x8x128xbf16> to vector<8x128xbf16>
    %c0_5 = arith.constant 0 : index
    %c0_6 = arith.constant 0 : index
    %c0_7 = arith.constant 0 : index
    %4 = vector.load %arg4[%c0_5, %c0_6, %c0_7] : memref<1x8x128xbf16, #tpu.memory_space<vmem>>, vector<1x8x128xbf16>
    %5 = vector.shape_cast %4 : vector<1x8x128xbf16> to vector<8x128xbf16>
    %6 = tpu.iota {dimensions = array<i32: 0>} : vector<8x8xi32>
    %7 = tpu.iota {dimensions = array<i32: 1>} : vector<8x8xi32>
    %8 = arith.cmpi sle, %7, %6 : vector<8x8xi32>
    %9 = vector.extract_strided_slice %1 {offsets = [0, 0], sizes = [8, 32], strides = [1, 1]} : vector<8x128xbf16> to vector<8x32xbf16>
    %cst = arith.constant 1.767580e-01 : bf16
    %10 = vector.broadcast %cst : bf16 to vector<8x32xbf16>
    %11 = arith.mulf %9, %10 : vector<8x32xbf16>
    %12 = vector.extract_strided_slice %3 {offsets = [0, 0], sizes = [8, 32], strides = [1, 1]} : vector<8x128xbf16> to vector<8x32xbf16>
    %13 = vector.extract_strided_slice %5 {offsets = [0, 0], sizes = [8, 32], strides = [1, 1]} : vector<8x128xbf16> to vector<8x32xbf16>
    %cst_8 = arith.constant dense<0.000000e+00> : vector<8x8xf32>
    %14 = tpu.matmul %11, %12, %cst_8 {dimension_numbers = #tpu.dot_dimension_numbers<[1], [1], [0], [0], [0, 0, 1, 0], [], []>} : vector<8x32xbf16>, vector<8x32xbf16>, vector<8x8xf32> -> vector<8x8xf32>
    %cst_9 = arith.constant -1.000000e+30 : f32
    %15 = vector.broadcast %cst_9 : f32 to vector<8x8xf32>
    %16 = arith.select %8, %14, %15 : vector<8x8xi1>, vector<8x8xf32>
    %cst_10 = arith.constant dense<0xFF800000> : vector<8xf32>
    %17 = vector.multi_reduction <maximumf>, %16, %cst_10 [1] : vector<8x8xf32> to vector<8xf32>
    %18 = vector.shape_cast %17 : vector<8xf32> to vector<8x1xf32>
    %19 = vector.broadcast %18 : vector<8x1xf32> to vector<8x8xf32>
    %20 = arith.subf %16, %19 : vector<8x8xf32>
    %21 = math.exp %20 : vector<8x8xf32>
    %cst_11 = arith.constant dense<0.000000e+00> : vector<8xf32>
    %22 = vector.multi_reduction <add>, %21, %cst_11 [1] : vector<8x8xf32> to vector<8xf32>
    %23 = vector.shape_cast %22 : vector<8xf32> to vector<8x1xf32>
    %24 = vector.broadcast %23 : vector<8x1xf32> to vector<8x8xf32>
    %25 = arith.divf %21, %24 : vector<8x8xf32>
    %26 = arith.truncf %25 : vector<8x8xf32> to vector<8x8xbf16>
    %cst_12 = arith.constant dense<0.000000e+00> : vector<8x32xf32>
    %27 = tpu.matmul %26, %13, %cst_12 {dimension_numbers = #tpu.dot_dimension_numbers<[1], [0], [0], [1], [0, 0, 1, 1], [], []>} : vector<8x8xbf16>, vector<8x32xbf16>, vector<8x32xf32> -> vector<8x32xf32>
    %28 = vector.extract_strided_slice %1 {offsets = [0, 32], sizes = [8, 32], strides = [1, 1]} : vector<8x128xbf16> to vector<8x32xbf16>
    %cst_13 = arith.constant 1.767580e-01 : bf16
    %29 = vector.broadcast %cst_13 : bf16 to vector<8x32xbf16>
    %30 = arith.mulf %28, %29 : vector<8x32xbf16>
    %31 = vector.extract_strided_slice %3 {offsets = [0, 32], sizes = [8, 32], strides = [1, 1]} : vector<8x128xbf16> to vector<8x32xbf16>
    %32 = vector.extract_strided_slice %5 {offsets = [0, 32], sizes = [8, 32], strides = [1, 1]} : vector<8x128xbf16> to vector<8x32xbf16>
    %cst_14 = arith.constant dense<0.000000e+00> : vector<8x8xf32>
    %33 = tpu.matmul %30, %31, %cst_14 {dimension_numbers = #tpu.dot_dimension_numbers<[1], [1], [0], [0], [0, 0, 1, 0], [], []>} : vector<8x32xbf16>, vector<8x32xbf16>, vector<8x8xf32> -> vector<8x8xf32>
    %cst_15 = arith.constant -1.000000e+30 : f32
    %34 = vector.broadcast %cst_15 : f32 to vector<8x8xf32>
    %35 = arith.select %8, %33, %34 : vector<8x8xi1>, vector<8x8xf32>
    %cst_16 = arith.constant dense<0xFF800000> : vector<8xf32>
    %36 = vector.multi_reduction <maximumf>, %35, %cst_16 [1] : vector<8x8xf32> to vector<8xf32>
    %37 = vector.shape_cast %36 : vector<8xf32> to vector<8x1xf32>
    %38 = vector.broadcast %37 : vector<8x1xf32> to vector<8x8xf32>
    %39 = arith.subf %35, %38 : vector<8x8xf32>
    %40 = math.exp %39 : vector<8x8xf32>
    %cst_17 = arith.constant dense<0.000000e+00> : vector<8xf32>
    %41 = vector.multi_reduction <add>, %40, %cst_17 [1] : vector<8x8xf32> to vector<8xf32>
    %42 = vector.shape_cast %41 : vector<8xf32> to vector<8x1xf32>
    %43 = vector.broadcast %42 : vector<8x1xf32> to vector<8x8xf32>
    %44 = arith.divf %40, %43 : vector<8x8xf32>
    %45 = arith.truncf %44 : vector<8x8xf32> to vector<8x8xbf16>
    %cst_18 = arith.constant dense<0.000000e+00> : vector<8x32xf32>
    %46 = tpu.matmul %45, %32, %cst_18 {dimension_numbers = #tpu.dot_dimension_numbers<[1], [0], [0], [1], [0, 0, 1, 1], [], []>} : vector<8x8xbf16>, vector<8x32xbf16>, vector<8x32xf32> -> vector<8x32xf32>
    %47 = vector.extract_strided_slice %1 {offsets = [0, 64], sizes = [8, 32], strides = [1, 1]} : vector<8x128xbf16> to vector<8x32xbf16>
    %cst_19 = arith.constant 1.767580e-01 : bf16
    %48 = vector.broadcast %cst_19 : bf16 to vector<8x32xbf16>
    %49 = arith.mulf %47, %48 : vector<8x32xbf16>
    %50 = vector.extract_strided_slice %3 {offsets = [0, 64], sizes = [8, 32], strides = [1, 1]} : vector<8x128xbf16> to vector<8x32xbf16>
    %51 = vector.extract_strided_slice %5 {offsets = [0, 64], sizes = [8, 32], strides = [1, 1]} : vector<8x128xbf16> to vector<8x32xbf16>
    %cst_20 = arith.constant dense<0.000000e+00> : vector<8x8xf32>
    %52 = tpu.matmul %49, %50, %cst_20 {dimension_numbers = #tpu.dot_dimension_numbers<[1], [1], [0], [0], [0, 0, 1, 0], [], []>} : vector<8x32xbf16>, vector<8x32xbf16>, vector<8x8xf32> -> vector<8x8xf32>
    %cst_21 = arith.constant -1.000000e+30 : f32
    %53 = vector.broadcast %cst_21 : f32 to vector<8x8xf32>
    %54 = arith.select %8, %52, %53 : vector<8x8xi1>, vector<8x8xf32>
    %cst_22 = arith.constant dense<0xFF800000> : vector<8xf32>
    %55 = vector.multi_reduction <maximumf>, %54, %cst_22 [1] : vector<8x8xf32> to vector<8xf32>
    %56 = vector.shape_cast %55 : vector<8xf32> to vector<8x1xf32>
    %57 = vector.broadcast %56 : vector<8x1xf32> to vector<8x8xf32>
    %58 = arith.subf %54, %57 : vector<8x8xf32>
    %59 = math.exp %58 : vector<8x8xf32>
    %cst_23 = arith.constant dense<0.000000e+00> : vector<8xf32>
    %60 = vector.multi_reduction <add>, %59, %cst_23 [1] : vector<8x8xf32> to vector<8xf32>
    %61 = vector.shape_cast %60 : vector<8xf32> to vector<8x1xf32>
    %62 = vector.broadcast %61 : vector<8x1xf32> to vector<8x8xf32>
    %63 = arith.divf %59, %62 : vector<8x8xf32>
    %64 = arith.truncf %63 : vector<8x8xf32> to vector<8x8xbf16>
    %cst_24 = arith.constant dense<0.000000e+00> : vector<8x32xf32>
    %65 = tpu.matmul %64, %51, %cst_24 {dimension_numbers = #tpu.dot_dimension_numbers<[1], [0], [0], [1], [0, 0, 1, 1], [], []>} : vector<8x8xbf16>, vector<8x32xbf16>, vector<8x32xf32> -> vector<8x32xf32>
    %66 = vector.extract_strided_slice %1 {offsets = [0, 96], sizes = [8, 32], strides = [1, 1]} : vector<8x128xbf16> to vector<8x32xbf16>
    %cst_25 = arith.constant 1.767580e-01 : bf16
    %67 = vector.broadcast %cst_25 : bf16 to vector<8x32xbf16>
    %68 = arith.mulf %66, %67 : vector<8x32xbf16>
    %69 = vector.extract_strided_slice %3 {offsets = [0, 96], sizes = [8, 32], strides = [1, 1]} : vector<8x128xbf16> to vector<8x32xbf16>
    %70 = vector.extract_strided_slice %5 {offsets = [0, 96], sizes = [8, 32], strides = [1, 1]} : vector<8x128xbf16> to vector<8x32xbf16>
    %cst_26 = arith.constant dense<0.000000e+00> : vector<8x8xf32>
    %71 = tpu.matmul %68, %69, %cst_26 {dimension_numbers = #tpu.dot_dimension_numbers<[1], [1], [0], [0], [0, 0, 1, 0], [], []>} : vector<8x32xbf16>, vector<8x32xbf16>, vector<8x8xf32> -> vector<8x8xf32>
    %cst_27 = arith.constant -1.000000e+30 : f32
    %72 = vector.broadcast %cst_27 : f32 to vector<8x8xf32>
    %73 = arith.select %8, %71, %72 : vector<8x8xi1>, vector<8x8xf32>
    %cst_28 = arith.constant dense<0xFF800000> : vector<8xf32>
    %74 = vector.multi_reduction <maximumf>, %73, %cst_28 [1] : vector<8x8xf32> to vector<8xf32>
    %75 = vector.shape_cast %74 : vector<8xf32> to vector<8x1xf32>
    %76 = vector.broadcast %75 : vector<8x1xf32> to vector<8x8xf32>
    %77 = arith.subf %73, %76 : vector<8x8xf32>
    %78 = math.exp %77 : vector<8x8xf32>
    %cst_29 = arith.constant dense<0.000000e+00> : vector<8xf32>
    %79 = vector.multi_reduction <add>, %78, %cst_29 [1] : vector<8x8xf32> to vector<8xf32>
    %80 = vector.shape_cast %79 : vector<8xf32> to vector<8x1xf32>
    %81 = vector.broadcast %80 : vector<8x1xf32> to vector<8x8xf32>
    %82 = arith.divf %78, %81 : vector<8x8xf32>
    %83 = arith.truncf %82 : vector<8x8xf32> to vector<8x8xbf16>
    %cst_30 = arith.constant dense<0.000000e+00> : vector<8x32xf32>
    %84 = tpu.matmul %83, %70, %cst_30 {dimension_numbers = #tpu.dot_dimension_numbers<[1], [0], [0], [1], [0, 0, 1, 1], [], []>} : vector<8x8xbf16>, vector<8x32xbf16>, vector<8x32xf32> -> vector<8x32xf32>
    %85 = tpu.concatenate %27, %46, %65, %84 in 1 : vector<8x32xf32>, vector<8x32xf32>, vector<8x32xf32>, vector<8x32xf32> -> vector<8x128xf32>
    %86 = arith.truncf %85 : vector<8x128xf32> to vector<8x128xbf16>
    %c0_31 = arith.constant 0 : index
    %c0_32 = arith.constant 0 : index
    %c0_33 = arith.constant 0 : index
    %87 = vector.load %arg5[%c0_31, %c0_32, %c0_33] : memref<1x8x128xbf16, #tpu.memory_space<vmem>>, vector<1x8x128xbf16>
    %88 = vector.shape_cast %87 : vector<1x8x128xbf16> to vector<8x128xbf16>
    %89 = vector.shape_cast %86 : vector<8x128xbf16> to vector<1x8x128xbf16>
    tpu.vector_store %arg5[%c0_31, %c0_32, %c0_33], %89 {strides = array<i32>} : memref<1x8x128xbf16, #tpu.memory_space<vmem>>, vector<1x8x128xbf16>,
    return
  }
  func.func @transform_0(%arg0: i32, %arg1: i32) -> (i32, i32, i32) {
    %c0_i32 = arith.constant 0 : i32
    %0 = arith.addi %c0_i32, %arg1 : i32
    %c0_i32_0 = arith.constant 0 : i32
    %c0_i32_1 = arith.constant 0 : i32
    return %arg0, %c0_i32_0, %0 : i32, i32, i32
  }
  func.func @transform_1(%arg0: i32, %arg1: i32) -> (i32, i32, i32) {
    %c1_i32 = arith.constant 1 : i32
    %0 = arith.addi %c1_i32, %arg1 : i32
    %c0_i32 = arith.constant 0 : i32
    %c0_i32_0 = arith.constant 0 : i32
    return %arg0, %c0_i32, %0 : i32, i32, i32
  }
  func.func @transform_2(%arg0: i32, %arg1: i32) -> (i32, i32, i32) {
    %c2_i32 = arith.constant 2 : i32
    %0 = arith.addi %c2_i32, %arg1 : i32
    %c0_i32 = arith.constant 0 : i32
    %c0_i32_0 = arith.constant 0 : i32
    return %arg0, %c0_i32, %0 : i32, i32, i32
  }
  func.func @transform_3(%arg0: i32, %arg1: i32) -> (i32, i32, i32) {
    %c0_i32 = arith.constant 0 : i32
    %c0_i32_0 = arith.constant 0 : i32
    return %arg0, %c0_i32, %arg1 : i32, i32, i32
  }
}

module attributes {stable_mosaic.version = 11 : i64} {
  func.func @kernel(%arg0: i32, %arg1: memref<16x128xbf16, #tpu.memory_space<vmem>>, %arg2: memref<128x128xbf16, #tpu.memory_space<vmem>>, %arg3: memref<1x128xf32, #tpu.memory_space<vmem>>, %arg4: memref<16x128xbf16, #tpu.memory_space<vmem>>, %arg5: memref<16x128xbf16, #tpu.memory_space<vmem>>) attributes {dimension_semantics = [#tpu.dimension_semantics<parallel>], iteration_bounds = array<i64: 1>, scalar_prefetch = 0 : i64, scratch_operands = 0 : i64, tpu.core_type = #tpu.core_type<tc>, window_params = [{transform_indices = @transform_0, window_bounds = array<i64: 16, 128>}, {pipeline_mode = #tpu.pipeline_mode<synchronous>, transform_indices = @transform_1, window_bounds = array<i64: 128, 128>}, {pipeline_mode = #tpu.pipeline_mode<synchronous>, transform_indices = @transform_2, window_bounds = array<i64: 1, 128>}, {transform_indices = @transform_3, window_bounds = array<i64: 16, 128>}, {transform_indices = @transform_4, window_bounds = array<i64: 16, 128>}]} {
    %c0 = arith.constant 0 : index
    %c0_0 = arith.constant 0 : index
    %0 = vector.load %arg1[%c0, %c0_0] : memref<16x128xbf16, #tpu.memory_space<vmem>>, vector<16x128xbf16>
    %c0_1 = arith.constant 0 : index
    %c0_2 = arith.constant 0 : index
    %1 = vector.load %arg2[%c0_1, %c0_2] : memref<128x128xbf16, #tpu.memory_space<vmem>>, vector<128x128xbf16>
    %cst = arith.constant dense<0.000000e+00> : vector<16x128xf32>
    %2 = tpu.matmul %0, %1, %cst {dimension_numbers = #tpu.dot_dimension_numbers<[1], [0], [0], [1], [0, 0, 1, 1], [], []>} : vector<16x128xbf16>, vector<128x128xbf16>, vector<16x128xf32> -> vector<16x128xf32>
    %c0_3 = arith.constant 0 : index
    %c0_4 = arith.constant 0 : index
    %3 = vector.load %arg3[%c0_3, %c0_4] : memref<1x128xf32, #tpu.memory_space<vmem>>, vector<1x128xf32>
    %4 = vector.broadcast %3 : vector<1x128xf32> to vector<16x128xf32>
    %5 = arith.addf %2, %4 : vector<16x128xf32>
    %c0_5 = arith.constant 0 : index
    %c0_6 = arith.constant 0 : index
    %6 = vector.load %arg4[%c0_5, %c0_6] : memref<16x128xbf16, #tpu.memory_space<vmem>>, vector<16x128xbf16>
    %7 = arith.extf %6 : vector<16x128xbf16> to vector<16x128xf32>
    %8 = arith.addf %5, %7 : vector<16x128xf32>
    %9 = arith.truncf %8 : vector<16x128xf32> to vector<16x128xbf16>
    %c0_7 = arith.constant 0 : index
    %c0_8 = arith.constant 0 : index
    %10 = vector.load %arg5[%c0_7, %c0_8] : memref<16x128xbf16, #tpu.memory_space<vmem>>, vector<16x128xbf16>
    tpu.vector_store %arg5[%c0_7, %c0_8], %9 {strides = array<i32>} : memref<16x128xbf16, #tpu.memory_space<vmem>>, vector<16x128xbf16>,
    return
  }
  func.func @transform_0(%arg0: i32) -> (i32, i32) {
    %c0_i32 = arith.constant 0 : i32
    %c0_i32_0 = arith.constant 0 : i32
    return %arg0, %c0_i32 : i32, i32
  }
  func.func @transform_1(%arg0: i32) -> (i32, i32) {
    %c0_i32 = arith.constant 0 : i32
    %c0_i32_0 = arith.constant 0 : i32
    %c0_i32_1 = arith.constant 0 : i32
    return %c0_i32, %c0_i32_0 : i32, i32
  }
  func.func @transform_2(%arg0: i32) -> (i32, i32) {
    %c0_i32 = arith.constant 0 : i32
    %c0_i32_0 = arith.constant 0 : i32
    %c0_i32_1 = arith.constant 0 : i32
    return %c0_i32, %c0_i32_0 : i32, i32
  }
  func.func @transform_3(%arg0: i32) -> (i32, i32) {
    %c0_i32 = arith.constant 0 : i32
    %c0_i32_0 = arith.constant 0 : i32
    return %arg0, %c0_i32 : i32, i32
  }
  func.func @transform_4(%arg0: i32) -> (i32, i32) {
    %c0_i32 = arith.constant 0 : i32
    %c0_i32_0 = arith.constant 0 : i32
    return %arg0, %c0_i32 : i32, i32
  }
}

module attributes {stable_mosaic.version = 11 : i64} {
  func.func @kernel(%arg0: i32, %arg1: memref<16x128xbf16, #tpu.memory_space<vmem>>, %arg2: memref<128x512xbf16, #tpu.memory_space<vmem>>, %arg3: memref<1x512xf32, #tpu.memory_space<vmem>>, %arg4: memref<1x128xf32, #tpu.memory_space<vmem>>, %arg5: memref<1x128xf32, #tpu.memory_space<vmem>>, %arg6: memref<16x512xbf16, #tpu.memory_space<vmem>>) attributes {dimension_semantics = [#tpu.dimension_semantics<parallel>], iteration_bounds = array<i64: 1>, scalar_prefetch = 0 : i64, scratch_operands = 0 : i64, tpu.core_type = #tpu.core_type<tc>, window_params = [{transform_indices = @transform_0, window_bounds = array<i64: 16, 128>}, {pipeline_mode = #tpu.pipeline_mode<synchronous>, transform_indices = @transform_1, window_bounds = array<i64: 128, 512>}, {pipeline_mode = #tpu.pipeline_mode<synchronous>, transform_indices = @transform_2, window_bounds = array<i64: 1, 512>}, {pipeline_mode = #tpu.pipeline_mode<synchronous>, transform_indices = @transform_3, window_bounds = array<i64: 1, 128>}, {pipeline_mode = #tpu.pipeline_mode<synchronous>, transform_indices = @transform_4, window_bounds = array<i64: 1, 128>}, {transform_indices = @transform_5, window_bounds = array<i64: 16, 512>}]} {
    %c0 = arith.constant 0 : index
    %c0_0 = arith.constant 0 : index
    %0 = vector.load %arg1[%c0, %c0_0] : memref<16x128xbf16, #tpu.memory_space<vmem>>, vector<16x128xbf16>
    %1 = arith.extf %0 : vector<16x128xbf16> to vector<16x128xf32>
    %cst = arith.constant dense<0.000000e+00> : vector<16xf32>
    %2 = vector.multi_reduction <add>, %1, %cst [1] : vector<16x128xf32> to vector<16xf32>
    %3 = vector.shape_cast %2 : vector<16xf32> to vector<16x1xf32>
    %cst_1 = arith.constant 1.280000e+02 : f32
    %4 = vector.broadcast %cst_1 : f32 to vector<16x1xf32>
    %5 = arith.divf %3, %4 : vector<16x1xf32>
    %6 = vector.broadcast %5 : vector<16x1xf32> to vector<16x128xf32>
    %7 = arith.subf %1, %6 : vector<16x128xf32>
    %8 = arith.mulf %7, %7 : vector<16x128xf32>
    %cst_2 = arith.constant dense<0.000000e+00> : vector<16xf32>
    %9 = vector.multi_reduction <add>, %8, %cst_2 [1] : vector<16x128xf32> to vector<16xf32>
    %10 = vector.shape_cast %9 : vector<16xf32> to vector<16x1xf32>
    %cst_3 = arith.constant 1.280000e+02 : f32
    %11 = vector.broadcast %cst_3 : f32 to vector<16x1xf32>
    %12 = arith.divf %10, %11 : vector<16x1xf32>
    %13 = vector.broadcast %5 : vector<16x1xf32> to vector<16x128xf32>
    %14 = arith.subf %1, %13 : vector<16x128xf32>
    %cst_4 = arith.constant 9.99999974E-6 : f32
    %15 = vector.broadcast %cst_4 : f32 to vector<16x1xf32>
    %16 = arith.addf %12, %15 : vector<16x1xf32>
    %17 = math.rsqrt %16 : vector<16x1xf32>
    %18 = vector.broadcast %17 : vector<16x1xf32> to vector<16x128xf32>
    %19 = arith.mulf %14, %18 : vector<16x128xf32>
    %c0_5 = arith.constant 0 : index
    %c0_6 = arith.constant 0 : index
    %20 = vector.load %arg4[%c0_5, %c0_6] : memref<1x128xf32, #tpu.memory_space<vmem>>, vector<1x128xf32>
    %21 = vector.broadcast %20 : vector<1x128xf32> to vector<16x128xf32>
    %22 = arith.mulf %19, %21 : vector<16x128xf32>
    %c0_7 = arith.constant 0 : index
    %c0_8 = arith.constant 0 : index
    %23 = vector.load %arg5[%c0_7, %c0_8] : memref<1x128xf32, #tpu.memory_space<vmem>>, vector<1x128xf32>
    %24 = vector.broadcast %23 : vector<1x128xf32> to vector<16x128xf32>
    %25 = arith.addf %22, %24 : vector<16x128xf32>
    %26 = arith.truncf %25 : vector<16x128xf32> to vector<16x128xbf16>
    %c0_9 = arith.constant 0 : index
    %c0_10 = arith.constant 0 : index
    %27 = vector.load %arg2[%c0_9, %c0_10] : memref<128x512xbf16, #tpu.memory_space<vmem>>, vector<128x512xbf16>
    %cst_11 = arith.constant dense<0.000000e+00> : vector<16x512xf32>
    %28 = tpu.matmul %26, %27, %cst_11 {dimension_numbers = #tpu.dot_dimension_numbers<[1], [0], [0], [1], [0, 0, 1, 1], [], []>} : vector<16x128xbf16>, vector<128x512xbf16>, vector<16x512xf32> -> vector<16x512xf32>
    %c0_12 = arith.constant 0 : index
    %c0_13 = arith.constant 0 : index
    %29 = vector.load %arg3[%c0_12, %c0_13] : memref<1x512xf32, #tpu.memory_space<vmem>>, vector<1x512xf32>
    %30 = vector.broadcast %29 : vector<1x512xf32> to vector<16x512xf32>
    %31 = arith.addf %28, %30 : vector<16x512xf32>
    %cst_14 = arith.constant 5.000000e-01 : f32
    %32 = vector.broadcast %cst_14 : f32 to vector<16x512xf32>
    %33 = arith.mulf %32, %31 : vector<16x512xf32>
    %34 = arith.mulf %31, %31 : vector<16x512xf32>
    %35 = arith.mulf %31, %34 : vector<16x512xf32>
    %cst_15 = arith.constant 4.471500e-02 : f32
    %36 = vector.broadcast %cst_15 : f32 to vector<16x512xf32>
    %37 = arith.mulf %36, %35 : vector<16x512xf32>
    %38 = arith.addf %31, %37 : vector<16x512xf32>
    %cst_16 = arith.constant 0.797884583 : f32
    %39 = vector.broadcast %cst_16 : f32 to vector<16x512xf32>
    %40 = arith.mulf %39, %38 : vector<16x512xf32>
    %41 = math.tanh %40 : vector<16x512xf32>
    %cst_17 = arith.constant 1.000000e+00 : f32
    %42 = vector.broadcast %cst_17 : f32 to vector<16x512xf32>
    %43 = arith.addf %42, %41 : vector<16x512xf32>
    %44 = arith.mulf %33, %43 : vector<16x512xf32>
    %45 = arith.truncf %44 : vector<16x512xf32> to vector<16x512xbf16>
    %c0_18 = arith.constant 0 : index
    %c0_19 = arith.constant 0 : index
    %46 = vector.load %arg6[%c0_18, %c0_19] : memref<16x512xbf16, #tpu.memory_space<vmem>>, vector<16x512xbf16>
    tpu.vector_store %arg6[%c0_18, %c0_19], %45 {strides = array<i32>} : memref<16x512xbf16, #tpu.memory_space<vmem>>, vector<16x512xbf16>,
    return
  }
  func.func @transform_0(%arg0: i32) -> (i32, i32) {
    %c0_i32 = arith.constant 0 : i32
    %c0_i32_0 = arith.constant 0 : i32
    return %arg0, %c0_i32 : i32, i32
  }
  func.func @transform_1(%arg0: i32) -> (i32, i32) {
    %c0_i32 = arith.constant 0 : i32
    %c0_i32_0 = arith.constant 0 : i32
    %c0_i32_1 = arith.constant 0 : i32
    return %c0_i32, %c0_i32_0 : i32, i32
  }
  func.func @transform_2(%arg0: i32) -> (i32, i32) {
    %c0_i32 = arith.constant 0 : i32
    %c0_i32_0 = arith.constant 0 : i32
    %c0_i32_1 = arith.constant 0 : i32
    return %c0_i32, %c0_i32_0 : i32, i32
  }
  func.func @transform_3(%arg0: i32) -> (i32, i32) {
    %c0_i32 = arith.constant 0 : i32
    %c0_i32_0 = arith.constant 0 : i32
    %c0_i32_1 = arith.constant 0 : i32
    return %c0_i32, %c0_i32_0 : i32, i32
  }
  func.func @transform_4(%arg0: i32) -> (i32, i32) {
    %c0_i32 = arith.constant 0 : i32
    %c0_i32_0 = arith.constant 0 : i32
    %c0_i32_1 = arith.constant 0 : i32
    return %c0_i32, %c0_i32_0 : i32, i32
  }
  func.func @transform_5(%arg0: i32) -> (i32, i32) {
    %c0_i32 = arith.constant 0 : i32
    %c0_i32_0 = arith.constant 0 : i32
    return %arg0, %c0_i32 : i32, i32
  }
}

module attributes {stable_mosaic.version = 11 : i64} {
  func.func @kernel(%arg0: i32, %arg1: memref<16x512xbf16, #tpu.memory_space<vmem>>, %arg2: memref<512x128xbf16, #tpu.memory_space<vmem>>, %arg3: memref<1x128xf32, #tpu.memory_space<vmem>>, %arg4: memref<16x128xbf16, #tpu.memory_space<vmem>>, %arg5: memref<16x128xbf16, #tpu.memory_space<vmem>>) attributes {dimension_semantics = [#tpu.dimension_semantics<parallel>], iteration_bounds = array<i64: 1>, scalar_prefetch = 0 : i64, scratch_operands = 0 : i64, tpu.core_type = #tpu.core_type<tc>, window_params = [{transform_indices = @transform_0, window_bounds = array<i64: 16, 512>}, {pipeline_mode = #tpu.pipeline_mode<synchronous>, transform_indices = @transform_1, window_bounds = array<i64: 512, 128>}, {pipeline_mode = #tpu.pipeline_mode<synchronous>, transform_indices = @transform_2, window_bounds = array<i64: 1, 128>}, {transform_indices = @transform_3, window_bounds = array<i64: 16, 128>}, {transform_indices = @transform_4, window_bounds = array<i64: 16, 128>}]} {
    %c0 = arith.constant 0 : index
    %c0_0 = arith.constant 0 : index
    %0 = vector.load %arg1[%c0, %c0_0] : memref<16x512xbf16, #tpu.memory_space<vmem>>, vector<16x512xbf16>
    %c0_1 = arith.constant 0 : index
    %c0_2 = arith.constant 0 : index
    %1 = vector.load %arg2[%c0_1, %c0_2] : memref<512x128xbf16, #tpu.memory_space<vmem>>, vector<512x128xbf16>
    %cst = arith.constant dense<0.000000e+00> : vector<16x128xf32>
    %2 = tpu.matmul %0, %1, %cst {dimension_numbers = #tpu.dot_dimension_numbers<[1], [0], [0], [1], [0, 0, 1, 1], [], []>} : vector<16x512xbf16>, vector<512x128xbf16>, vector<16x128xf32> -> vector<16x128xf32>
    %c0_3 = arith.constant 0 : index
    %c0_4 = arith.constant 0 : index
    %3 = vector.load %arg3[%c0_3, %c0_4] : memref<1x128xf32, #tpu.memory_space<vmem>>, vector<1x128xf32>
    %4 = vector.broadcast %3 : vector<1x128xf32> to vector<16x128xf32>
    %5 = arith.addf %2, %4 : vector<16x128xf32>
    %c0_5 = arith.constant 0 : index
    %c0_6 = arith.constant 0 : index
    %6 = vector.load %arg4[%c0_5, %c0_6] : memref<16x128xbf16, #tpu.memory_space<vmem>>, vector<16x128xbf16>
    %7 = arith.extf %6 : vector<16x128xbf16> to vector<16x128xf32>
    %8 = arith.addf %5, %7 : vector<16x128xf32>
    %9 = arith.truncf %8 : vector<16x128xf32> to vector<16x128xbf16>
    %c0_7 = arith.constant 0 : index
    %c0_8 = arith.constant 0 : index
    %10 = vector.load %arg5[%c0_7, %c0_8] : memref<16x128xbf16, #tpu.memory_space<vmem>>, vector<16x128xbf16>
    tpu.vector_store %arg5[%c0_7, %c0_8], %9 {strides = array<i32>} : memref<16x128xbf16, #tpu.memory_space<vmem>>, vector<16x128xbf16>,
    return
  }
  func.func @transform_0(%arg0: i32) -> (i32, i32) {
    %c0_i32 = arith.constant 0 : i32
    %c0_i32_0 = arith.constant 0 : i32
    return %arg0, %c0_i32 : i32, i32
  }
  func.func @transform_1(%arg0: i32) -> (i32, i32) {
    %c0_i32 = arith.constant 0 : i32
    %c0_i32_0 = arith.constant 0 : i32
    %c0_i32_1 = arith.constant 0 : i32
    return %c0_i32, %c0_i32_0 : i32, i32
  }
  func.func @transform_2(%arg0: i32) -> (i32, i32) {
    %c0_i32 = arith.constant 0 : i32
    %c0_i32_0 = arith.constant 0 : i32
    %c0_i32_1 = arith.constant 0 : i32
    return %c0_i32, %c0_i32_0 : i32, i32
  }
  func.func @transform_3(%arg0: i32) -> (i32, i32) {
    %c0_i32 = arith.constant 0 : i32
    %c0_i32_0 = arith.constant 0 : i32
    return %arg0, %c0_i32 : i32, i32
  }
  func.func @transform_4(%arg0: i32) -> (i32, i32) {
    %c0_i32 = arith.constant 0 : i32
    %c0_i32_0 = arith.constant 0 : i32
    return %arg0, %c0_i32 : i32, i32
  }
}

module attributes {stable_mosaic.version = 11 : i64} {
  func.func @kernel(%arg0: i32, %arg1: i32, %arg2: memref<16x128xbf16, #tpu.memory_space<vmem>>, %arg3: memref<128x512xbf16, #tpu.memory_space<vmem>>, %arg4: memref<1x128xf32, #tpu.memory_space<vmem>>, %arg5: memref<1x128xf32, #tpu.memory_space<vmem>>, %arg6: memref<16x1xi32, #tpu.memory_space<vmem>>, %arg7: memref<16x512xbf16, #tpu.memory_space<vmem>>, %arg8: memref<16x1xf32, #tpu.memory_space<vmem>>, %arg9: memref<16x128xbf16, #tpu.memory_space<vmem>>, %arg10: memref<16x1xf32, #tpu.memory_space<vmem>>, %arg11: memref<16x1xf32, #tpu.memory_space<vmem>>, %arg12: memref<16x1xf32, #tpu.memory_space<vmem>>) attributes {dimension_semantics = [#tpu.dimension_semantics<parallel>, #tpu.dimension_semantics<arbitrary>], iteration_bounds = array<i64: 1, 2>, scalar_prefetch = 0 : i64, scratch_operands = 4 : i64, tpu.core_type = #tpu.core_type<tc>, window_params = [{transform_indices = @transform_0, window_bounds = array<i64: 16, 128>}, {transform_indices = @transform_1, window_bounds = array<i64: 128, 512>}, {pipeline_mode = #tpu.pipeline_mode<synchronous>, transform_indices = @transform_2, window_bounds = array<i64: 1, 128>}, {pipeline_mode = #tpu.pipeline_mode<synchronous>, transform_indices = @transform_3, window_bounds = array<i64: 1, 128>}, {transform_indices = @transform_4, window_bounds = array<i64: 16, 1>}, {transform_indices = @transform_5, window_bounds = array<i64: 16, 512>}, {transform_indices = @transform_6, window_bounds = array<i64: 16, 1>}]} {
    %c0_i32 = arith.constant 0 : i32
    %0 = arith.cmpi eq, %arg1, %c0_i32 : i32
    %1 = arith.extui %0 : i1 to i32
    %c0_i32_0 = arith.constant 0 : i32
    %2 = arith.cmpi ne, %1, %c0_i32_0 : i32
    scf.if %2 {
      %c0_28 = arith.constant 0 : index
      %c0_29 = arith.constant 0 : index
      %46 = vector.load %arg2[%c0_28, %c0_29] : memref<16x128xbf16, #tpu.memory_space<vmem>>, vector<16x128xbf16>
      %47 = arith.extf %46 : vector<16x128xbf16> to vector<16x128xf32>
      %cst_30 = arith.constant dense<0.000000e+00> : vector<16xf32>
      %48 = vector.multi_reduction <add>, %47, %cst_30 [1] : vector<16x128xf32> to vector<16xf32>
      %49 = vector.shape_cast %48 : vector<16xf32> to vector<16x1xf32>
      %cst_31 = arith.constant 1.280000e+02 : f32
      %50 = vector.broadcast %cst_31 : f32 to vector<16x1xf32>
      %51 = arith.divf %49, %50 : vector<16x1xf32>
      %52 = vector.broadcast %51 : vector<16x1xf32> to vector<16x128xf32>
      %53 = arith.subf %47, %52 : vector<16x128xf32>
      %54 = arith.mulf %53, %53 : vector<16x128xf32>
      %cst_32 = arith.constant dense<0.000000e+00> : vector<16xf32>
      %55 = vector.multi_reduction <add>, %54, %cst_32 [1] : vector<16x128xf32> to vector<16xf32>
      %56 = vector.shape_cast %55 : vector<16xf32> to vector<16x1xf32>
      %cst_33 = arith.constant 1.280000e+02 : f32
      %57 = vector.broadcast %cst_33 : f32 to vector<16x1xf32>
      %58 = arith.divf %56, %57 : vector<16x1xf32>
      %59 = vector.broadcast %51 : vector<16x1xf32> to vector<16x128xf32>
      %60 = arith.subf %47, %59 : vector<16x128xf32>
      %cst_34 = arith.constant 9.99999974E-6 : f32
      %61 = vector.broadcast %cst_34 : f32 to vector<16x1xf32>
      %62 = arith.addf %58, %61 : vector<16x1xf32>
      %63 = math.rsqrt %62 : vector<16x1xf32>
      %64 = vector.broadcast %63 : vector<16x1xf32> to vector<16x128xf32>
      %65 = arith.mulf %60, %64 : vector<16x128xf32>
      %c0_35 = arith.constant 0 : index
      %c0_36 = arith.constant 0 : index
      %66 = vector.load %arg4[%c0_35, %c0_36] : memref<1x128xf32, #tpu.memory_space<vmem>>, vector<1x128xf32>
      %67 = vector.broadcast %66 : vector<1x128xf32> to vector<16x128xf32>
      %68 = arith.mulf %65, %67 : vector<16x128xf32>
      %c0_37 = arith.constant 0 : index
      %c0_38 = arith.constant 0 : index
      %69 = vector.load %arg5[%c0_37, %c0_38] : memref<1x128xf32, #tpu.memory_space<vmem>>, vector<1x128xf32>
      %70 = vector.broadcast %69 : vector<1x128xf32> to vector<16x128xf32>
      %71 = arith.addf %68, %70 : vector<16x128xf32>
      %72 = arith.truncf %71 : vector<16x128xf32> to vector<16x128xbf16>
      %c0_39 = arith.constant 0 : index
      %c0_40 = arith.constant 0 : index
      %73 = vector.load %arg9[%c0_39, %c0_40] : memref<16x128xbf16, #tpu.memory_space<vmem>>, vector<16x128xbf16>
      tpu.vector_store %arg9[%c0_39, %c0_40], %72 {strides = array<i32>} : memref<16x128xbf16, #tpu.memory_space<vmem>>, vector<16x128xbf16>,
      %cst_41 = arith.constant 0xFF800000 : f32
      %74 = vector.broadcast %cst_41 : f32 to vector<16x1xf32>
      %c0_42 = arith.constant 0 : index
      %c0_43 = arith.constant 0 : index
      %75 = vector.load %arg10[%c0_42, %c0_43] : memref<16x1xf32, #tpu.memory_space<vmem>>, vector<16x1xf32>
      tpu.vector_store %arg10[%c0_42, %c0_43], %74 {strides = array<i32>} : memref<16x1xf32, #tpu.memory_space<vmem>>, vector<16x1xf32>,
      %cst_44 = arith.constant 0.000000e+00 : f32
      %76 = vector.broadcast %cst_44 : f32 to vector<16x1xf32>
      %c0_45 = arith.constant 0 : index
      %c0_46 = arith.constant 0 : index
      %77 = vector.load %arg11[%c0_45, %c0_46] : memref<16x1xf32, #tpu.memory_space<vmem>>, vector<16x1xf32>
      tpu.vector_store %arg11[%c0_45, %c0_46], %76 {strides = array<i32>} : memref<16x1xf32, #tpu.memory_space<vmem>>, vector<16x1xf32>,
      %cst_47 = arith.constant 0.000000e+00 : f32
      %78 = vector.broadcast %cst_47 : f32 to vector<16x1xf32>
      %c0_48 = arith.constant 0 : index
      %c0_49 = arith.constant 0 : index
      %79 = vector.load %arg12[%c0_48, %c0_49] : memref<16x1xf32, #tpu.memory_space<vmem>>, vector<16x1xf32>
      tpu.vector_store %arg12[%c0_48, %c0_49], %78 {strides = array<i32>} : memref<16x1xf32, #tpu.memory_space<vmem>>, vector<16x1xf32>,
    } else {
    }
    %c0 = arith.constant 0 : index
    %c0_1 = arith.constant 0 : index
    %3 = vector.load %arg9[%c0, %c0_1] : memref<16x128xbf16, #tpu.memory_space<vmem>>, vector<16x128xbf16>
    %c0_2 = arith.constant 0 : index
    %c0_3 = arith.constant 0 : index
    %4 = vector.load %arg3[%c0_2, %c0_3] : memref<128x512xbf16, #tpu.memory_space<vmem>>, vector<128x512xbf16>
    %cst = arith.constant dense<0.000000e+00> : vector<16x512xf32>
    %5 = tpu.matmul %3, %4, %cst {dimension_numbers = #tpu.dot_dimension_numbers<[1], [0], [0], [1], [0, 0, 1, 1], [], []>} : vector<16x128xbf16>, vector<128x512xbf16>, vector<16x512xf32> -> vector<16x512xf32>
    %6 = arith.truncf %5 : vector<16x512xf32> to vector<16x512xbf16>
    %c0_4 = arith.constant 0 : index
    %c0_5 = arith.constant 0 : index
    %7 = vector.load %arg7[%c0_4, %c0_5] : memref<16x512xbf16, #tpu.memory_space<vmem>>, vector<16x512xbf16>
    tpu.vector_store %arg7[%c0_4, %c0_5], %6 {strides = array<i32>} : memref<16x512xbf16, #tpu.memory_space<vmem>>, vector<16x512xbf16>,
    %c0_6 = arith.constant 0 : index
    %c0_7 = arith.constant 0 : index
    %8 = vector.load %arg6[%c0_6, %c0_7] : memref<16x1xi32, #tpu.memory_space<vmem>>, vector<16x1xi32>
    %9 = tpu.iota {dimensions = array<i32: 1>} : vector<16x512xi32>
    %c512_i32 = arith.constant 512 : i32
    %10 = arith.muli %arg1, %c512_i32 : i32
    %11 = vector.broadcast %10 : i32 to vector<16x512xi32>
    %12 = arith.addi %9, %11 : vector<16x512xi32>
    %c640_i32 = arith.constant 640 : i32
    %13 = vector.broadcast %c640_i32 : i32 to vector<16x512xi32>
    %14 = arith.cmpi slt, %12, %13 : vector<16x512xi32>
    %cst_8 = arith.constant 0xFF800000 : f32
    %15 = vector.broadcast %cst_8 : f32 to vector<16x512xf32>
    %16 = arith.select %14, %5, %15 : vector<16x512xi1>, vector<16x512xf32>
    %c0_9 = arith.constant 0 : index
    %c0_10 = arith.constant 0 : index
    %17 = vector.load %arg10[%c0_9, %c0_10] : memref<16x1xf32, #tpu.memory_space<vmem>>, vector<16x1xf32>
    %cst_11 = arith.constant dense<0xFF800000> : vector<16xf32>
    %18 = vector.multi_reduction <maximumf>, %16, %cst_11 [1] : vector<16x512xf32> to vector<16xf32>
    %19 = vector.shape_cast %18 : vector<16xf32> to vector<16x1xf32>
    %20 = arith.maximumf %17, %19 : vector<16x1xf32>
    %c0_12 = arith.constant 0 : index
    %c0_13 = arith.constant 0 : index
    %21 = vector.load %arg11[%c0_12, %c0_13] : memref<16x1xf32, #tpu.memory_space<vmem>>, vector<16x1xf32>
    %c0_14 = arith.constant 0 : index
    %c0_15 = arith.constant 0 : index
    %22 = vector.load %arg10[%c0_14, %c0_15] : memref<16x1xf32, #tpu.memory_space<vmem>>, vector<16x1xf32>
    %23 = arith.subf %22, %20 : vector<16x1xf32>
    %24 = math.exp %23 : vector<16x1xf32>
    %25 = arith.mulf %21, %24 : vector<16x1xf32>
    %26 = vector.broadcast %20 : vector<16x1xf32> to vector<16x512xf32>
    %27 = arith.subf %16, %26 : vector<16x512xf32>
    %28 = math.exp %27 : vector<16x512xf32>
    %cst_16 = arith.constant dense<0.000000e+00> : vector<16xf32>
    %29 = vector.multi_reduction <add>, %28, %cst_16 [1] : vector<16x512xf32> to vector<16xf32>
    %30 = vector.shape_cast %29 : vector<16xf32> to vector<16x1xf32>
    %31 = arith.addf %25, %30 : vector<16x1xf32>
    %c0_17 = arith.constant 0 : index
    %c0_18 = arith.constant 0 : index
    %32 = vector.load %arg11[%c0_17, %c0_18] : memref<16x1xf32, #tpu.memory_space<vmem>>, vector<16x1xf32>
    tpu.vector_store %arg11[%c0_17, %c0_18], %31 {strides = array<i32>} : memref<16x1xf32, #tpu.memory_space<vmem>>, vector<16x1xf32>,
    %c0_19 = arith.constant 0 : index
    %c0_20 = arith.constant 0 : index
    %33 = vector.load %arg12[%c0_19, %c0_20] : memref<16x1xf32, #tpu.memory_space<vmem>>, vector<16x1xf32>
    %34 = vector.broadcast %8 : vector<16x1xi32> to vector<16x512xi32>
    %35 = arith.cmpi eq, %12, %34 : vector<16x512xi32>
    %cst_21 = arith.constant 0.000000e+00 : f32
    %36 = vector.broadcast %cst_21 : f32 to vector<16x512xf32>
    %37 = arith.select %35, %5, %36 : vector<16x512xi1>, vector<16x512xf32>
    %cst_22 = arith.constant dense<0.000000e+00> : vector<16xf32>
    %38 = vector.multi_reduction <add>, %37, %cst_22 [1] : vector<16x512xf32> to vector<16xf32>
    %39 = vector.shape_cast %38 : vector<16xf32> to vector<16x1xf32>
    %40 = arith.addf %33, %39 : vector<16x1xf32>
    %c0_23 = arith.constant 0 : index
    %c0_24 = arith.constant 0 : index
    %41 = vector.load %arg12[%c0_23, %c0_24] : memref<16x1xf32, #tpu.memory_space<vmem>>, vector<16x1xf32>
    tpu.vector_store %arg12[%c0_23, %c0_24], %40 {strides = array<i32>} : memref<16x1xf32, #tpu.memory_space<vmem>>, vector<16x1xf32>,
    %c0_25 = arith.constant 0 : index
    %c0_26 = arith.constant 0 : index
    %42 = vector.load %arg10[%c0_25, %c0_26] : memref<16x1xf32, #tpu.memory_space<vmem>>, vector<16x1xf32>
    tpu.vector_store %arg10[%c0_25, %c0_26], %20 {strides = array<i32>} : memref<16x1xf32, #tpu.memory_space<vmem>>, vector<16x1xf32>,
    %c1_i32 = arith.constant 1 : i32
    %43 = arith.cmpi eq, %arg1, %c1_i32 : i32
    %44 = arith.extui %43 : i1 to i32
    %c0_i32_27 = arith.constant 0 : i32
    %45 = arith.cmpi ne, %44, %c0_i32_27 : i32
    scf.if %45 {
      %c-100_i32 = arith.constant -100 : i32
      %46 = vector.broadcast %c-100_i32 : i32 to vector<16x1xi32>
      %47 = arith.cmpi ne, %8, %46 : vector<16x1xi32>
      %48 = arith.extui %47 : vector<16x1xi1> to vector<16x1xi32>
      %49 = arith.sitofp %48 : vector<16x1xi32> to vector<16x1xf32>
      %c0_28 = arith.constant 0 : index
      %c0_29 = arith.constant 0 : index
      %50 = vector.load %arg10[%c0_28, %c0_29] : memref<16x1xf32, #tpu.memory_space<vmem>>, vector<16x1xf32>
      %c0_30 = arith.constant 0 : index
      %c0_31 = arith.constant 0 : index
      %51 = vector.load %arg11[%c0_30, %c0_31] : memref<16x1xf32, #tpu.memory_space<vmem>>, vector<16x1xf32>
      %52 = math.log %51 : vector<16x1xf32>
      %53 = arith.addf %50, %52 : vector<16x1xf32>
      %c0_32 = arith.constant 0 : index
      %c0_33 = arith.constant 0 : index
      %54 = vector.load %arg12[%c0_32, %c0_33] : memref<16x1xf32, #tpu.memory_space<vmem>>, vector<16x1xf32>
      %55 = arith.subf %53, %54 : vector<16x1xf32>
      %56 = arith.mulf %55, %49 : vector<16x1xf32>
      %c0_34 = arith.constant 0 : index
      %c0_35 = arith.constant 0 : index
      %57 = vector.load %arg8[%c0_34, %c0_35] : memref<16x1xf32, #tpu.memory_space<vmem>>, vector<16x1xf32>
      tpu.vector_store %arg8[%c0_34, %c0_35], %56 {strides = array<i32>} : memref<16x1xf32, #tpu.memory_space<vmem>>, vector<16x1xf32>,
    } else {
    }
    return
  }
  func.func @transform_0(%arg0: i32, %arg1: i32) -> (i32, i32) {
    %c0_i32 = arith.constant 0 : i32
    %c0_i32_0 = arith.constant 0 : i32
    return %arg0, %c0_i32 : i32, i32
  }
  func.func @transform_1(%arg0: i32, %arg1: i32) -> (i32, i32) {
    %c0_i32 = arith.constant 0 : i32
    %c0_i32_0 = arith.constant 0 : i32
    return %c0_i32, %arg1 : i32, i32
  }
  func.func @transform_2(%arg0: i32, %arg1: i32) -> (i32, i32) {
    %c0_i32 = arith.constant 0 : i32
    %c0_i32_0 = arith.constant 0 : i32
    %c0_i32_1 = arith.constant 0 : i32
    return %c0_i32, %c0_i32_0 : i32, i32
  }
  func.func @transform_3(%arg0: i32, %arg1: i32) -> (i32, i32) {
    %c0_i32 = arith.constant 0 : i32
    %c0_i32_0 = arith.constant 0 : i32
    %c0_i32_1 = arith.constant 0 : i32
    return %c0_i32, %c0_i32_0 : i32, i32
  }
  func.func @transform_4(%arg0: i32, %arg1: i32) -> (i32, i32) {
    %c0_i32 = arith.constant 0 : i32
    %c0_i32_0 = arith.constant 0 : i32
    return %arg0, %c0_i32 : i32, i32
  }
  func.func @transform_5(%arg0: i32, %arg1: i32) -> (i32, i32) {
    %c0_i32 = arith.constant 0 : i32
    return %arg0, %arg1 : i32, i32
  }
  func.func @transform_6(%arg0: i32, %arg1: i32) -> (i32, i32) {
    %c0_i32 = arith.constant 0 : i32
    %c0_i32_0 = arith.constant 0 : i32
    return %arg0, %c0_i32 : i32, i32
  }
}

</mosaic_0001>

<bundles_post_ra>
// kernel: cagm_forward.13
= control target key start
LH: loop header
LB: loop body
LE: loop exit
PB: predicated region body
PF: predicated region fallthrough
CT: control target
= control target key end

     0   :  { %v221_v0 = vmov 0.0   ;;  %vm222_vm0 = vmmov 0   ;;  %s284_s1 = inlined_call_operand.vmem [shape: bf16[128,128], index: 1, kind: input, shape index: {}]   ;;  %s285_s0 = inlined_call_operand.vmem [shape: bf16[16,128], index: 0, kind: input, shape index: {}]   ;;  %s286_s2 = inlined_call_operand.vmem [shape: f32[1,128], index: 2, kind: input, shape index: {}]   ;;  %s287_s3 = inlined_call_operand.vmem [shape: bf16[16,128], index: 3, kind: input, shape index: {}]   ;;  %s288_s4 = inlined_call_operand.vmem [shape: bf16[16,128], index: 4, kind: output, shape index: {}]  }
   0x1   :  { %190 = vmatprep.subr.bf16.mxu0 %v221_v0  ;;  %v212_v1 = vld [vmem:[%s284_s1] sm:$0xff]   ;;  %206 = vmatprep.mubr.msk.bf16.mxu0 %vm222_vm0, %v221_v0  ;;  %v213_v2 = vld [vmem:[%s284_s1 + $0x8] sm:$0xff]   ;;  %v214_v3 = vld [vmem:[%s284_s1 + $0x10] sm:$0xff]  }
   0x2   :  { %191 = vmatpush3.bf16.msra.mxu0 %v212_v1  ;;  %v215_v4 = vld [vmem:[%s284_s1 + $0x18] sm:$0xff]   ;;  %v216_v5 = vld [vmem:[%s284_s1 + $0x20] sm:$0xff]   ;;  %v217_v6 = vld [vmem:[%s284_s1 + $0x28] sm:$0xff]  }
   0x3   :  { %192 = vmatprep.subr.bf16.mxu0 %v221_v0  ;;  %v218_v7 = vld [vmem:[%s284_s1 + $0x30] sm:$0xff]   ;;  %v219_v8 = vld [vmem:[%s284_s1 + $0x38] sm:$0xff]   ;;  %v220_v9 = vld [vmem:[%s285_s0] sm:$0xff]  }
   0x4   :  { %v158_v10 = vld [vmem:[%s286_s2] ss:$0 sm:$0xff] }
   0x5   :  { %v173_v11 = vld [vmem:[%s287_s3] sm:$0xff]  }
   0x6   :  { %193 = vmatpush3.bf16.msra.mxu0 %v213_v2  ;;  %v174_v14 = vunpack.c.l.bf16 %v173_v11  ;;  %v175_v16 = vunpack.c.h.bf16 %v173_v11 }
   0x7   :  { %194 = vmatprep.subr.bf16.mxu0 %v221_v0 }
   0xa   :  { %195 = vmatpush3.bf16.msra.mxu0 %v214_v3 }
   0xb   :  { %196 = vmatprep.subr.bf16.mxu0 %v221_v0 }
   0xe   :  { %197 = vmatpush3.bf16.msra.mxu0 %v215_v4 }
   0xf   :  { %198 = vmatprep.subr.bf16.mxu0 %v221_v0 }
  0x12   :  { %199 = vmatpush3.bf16.msra.mxu0 %v216_v5 }
  0x13   :  { %200 = vmatprep.subr.bf16.mxu0 %v221_v0 }
  0x16   :  { %201 = vmatpush3.bf16.msra.mxu0 %v217_v6 }
  0x17   :  { %202 = vmatprep.subr.bf16.mxu0 %v221_v0 }
  0x1a   :  { %203 = vmatpush3.bf16.msra.mxu0 %v218_v7 }
  0x1b   :  { %204 = vmatprep.subr.bf16.mxu0 %v221_v0 }
  0x1e   :  { %205 = vmatpush3.bf16.msra.mxu0 %v219_v8 }
  0x21   :  { %207 = vmatmul.mubr.bf16.vlgmr.msra.gmra.mrb[0].mxu0 %v220_v9 }
  0xf4   :  { %v131_v12 = vpop.f32.mrb[0].mxu0 }
  0xf5   :  { %v132_v13 = vadd.f32 %v158_v10, %v131_v12  ;;  %v208_v15 = vpop.f32.mrb[1].mxu0 }
  0xf6   :  { %v134_v17 = vpop.f32.mrb[2].mxu0 }
  0xf7   :  { %v135_v18 = vadd.f32 %v158_v10, %v134_v17  ;;  %v209_v19 = vpop.f32.mrb[3].mxu0  ;;  %v142_v20 = vadd.f32 %v174_v14, %v132_v13 }
  0xf9   :  { %v143_v21 = vadd.f32 %v175_v16, %v135_v18 }
  0xfb   :  { %v179_v22 = vpack.c.bf16 %v143_v21, %v142_v20 }
  0xfd   :  { %180 = vst [vmem:[%s288_s4] sm:$0xff] %v179_v22  }

// kernel: cagm_forward.11
= control target key start
LH: loop header
LB: loop body
LE: loop exit
PB: predicated region body
PF: predicated region fallthrough
CT: control target
= control target key end

     0   :  { %v462_v4 = vmov 0.0   ;;  %v463_v31 = vmov 0   ;;  %vm464_vm0 = vmmov 0   ;;  %v101_v54 = vlaneseq  ;;  %s610_s0 = inlined_call_operand.vmem [shape: bf16[16,128], index: 0, kind: input, shape index: {}]   ;;  %s611_s1 = inlined_call_operand.vmem [shape: bf16[128,384], index: 1, kind: input, shape index: {}]   ;;  %s612_s3 = inlined_call_operand.vmem [shape: f32[1,128], index: 3, kind: input, shape index: {}]   ;;  %s613_s4 = inlined_call_operand.vmem [shape: f32[1,128], index: 4, kind: input, shape index: {}]   ;;  %s614_s2 = inlined_call_operand.vmem [shape: f32[1,384], index: 2, kind: input, shape index: {}]   ;;  %s615_s5 = inlined_call_operand.vmem [shape: bf16[16,384], index: 5, kind: output, shape index: {}]  }
   0x1   :  { %v391_v0 = vld [vmem:[%s610_s0] sm:$0xff]   ;;  %403 = vmatprep.subr.bf16.mxu1 %v462_v4  ;;  %v429_v6 = vld [vmem:[%s611_s1 + $0x8] ss:$12 sps:$4 sm:$0xff]   ;;  %v436_v19 = vld [vmem:[%s611_s1 + $0x30] ss:$12 sps:$4 sm:$0xff]   ;;  %276 = vmatprep.mubr.bf16.mxu0 %v463_v31 }
   0x2   :  { %v392_v1 = vunpack.c.l.bf16 %v391_v0  ;;  %v393_v2 = vunpack.c.h.bf16 %v391_v0  ;;  %v426_v3 = vld [vmem:[%s611_s1 + $0x4] ss:$12 sps:$4 sm:$0xff]   ;;  %v428_v5 = vld [vmem:[%s611_s1] ss:$12 sps:$4 sm:$0xff]   ;;  %v430_v7 = vld [vmem:[%s611_s1 + $0x1c] ss:$12 sps:$4 sm:$0xff]   ;;  %404 = vmatpush3.bf16.msra.mxu1 %v429_v6  ;;  %419 = vmatprep.mubr.msk.bf16.mxu1 %vm464_vm0, %v462_v4 }
   0x3   :  { %244 = vmatprep.subr.bf16.mxu0 %v426_v3  ;;  %405 = vmatprep.subr.bf16.mxu1 %v462_v4  ;;  %v432_v16 = vld [vmem:[%s611_s1 + $0x18] ss:$12 sps:$4 sm:$0xff]   ;;  %v433_v17 = vld [vmem:[%s611_s1 + $0x20] ss:$12 sps:$4 sm:$0xff]   ;;  %v440_v22 = vld [vmem:[%s611_s1 + $0x48] ss:$12 sps:$4 sm:$0xff]  }
   0x4   :  { %25 = vadd.xlane.f32.xlu0 %v392_v1  ;;  %245 = vmatpush1.bf16.msra.mxu0 %v428_v5  ;;  %v434_v18 = vld [vmem:[%s611_s1 + $0x34] ss:$12 sps:$4 sm:$0xff]   ;;  %v437_v20 = vld [vmem:[%s611_s1 + $0x38] ss:$12 sps:$4 sm:$0xff]   ;;  %v441_v23 = vld [vmem:[%s611_s1 + $0x50] ss:$12 sps:$4 sm:$0xff]  }
   0x5   :  { %246 = vmatprep.subr.bf16.mxu0 %v430_v7  ;;  %v438_v21 = vld [vmem:[%s611_s1 + $0x4c] ss:$12 sps:$4 sm:$0xff]   ;;  %v442_v24 = vld [vmem:[%s611_s1 + $0x64] ss:$12 sps:$4 sm:$0xff]   ;;  %v445_v26 = vld [vmem:[%s611_s1 + $0x68] ss:$12 sps:$4 sm:$0xff]  }
   0x6   :  { %406 = vmatpush3.bf16.msra.mxu1 %v433_v17  ;;  %v444_v25 = vld [vmem:[%s611_s1 + $0x60] ss:$12 sps:$4 sm:$0xff]   ;;  %v446_v27 = vld [vmem:[%s611_s1 + $0x7c] ss:$12 sps:$4 sm:$0xff]   ;;  %v448_v28 = vld [vmem:[%s611_s1 + $0x78] ss:$12 sps:$4 sm:$0xff]  }
   0x7   :  { %407 = vmatprep.subr.bf16.mxu1 %v462_v4  ;;  %v449_v29 = vld [vmem:[%s611_s1 + $0x80] ss:$12 sps:$4 sm:$0xff]   ;;  %v452_v32 = vld [vmem:[%s611_s1 + $0x90] ss:$12 sps:$4 sm:$0xff]   ;;  %v453_v33 = vld [vmem:[%s611_s1 + $0x98] ss:$12 sps:$4 sm:$0xff]  }
   0x8   :  { %27 = vadd.xlane.f32.xlu0 %v393_v2  ;;  %247 = vmatpush1.bf16.msra.mxu0 %v432_v16  ;;  %v450_v30 = vld [vmem:[%s611_s1 + $0x94] ss:$12 sps:$4 sm:$0xff]   ;;  %v454_v34 = vld [vmem:[%s611_s1 + $0xac] ss:$12 sps:$4 sm:$0xff]   ;;  %v457_v36 = vld [vmem:[%s611_s1 + $0xb0] ss:$12 sps:$4 sm:$0xff]  }
   0x9   :  { %248 = vmatprep.subr.bf16.mxu0 %v434_v18  ;;  %v456_v35 = vld [vmem:[%s611_s1 + $0xa8] ss:$12 sps:$4 sm:$0xff]   ;;  %v356_v45 = vld [vmem:[%s612_s3] ss:$0 sm:$0xff]  ;;  %v102_v55 = vshrl.u32 %v101_v54, 7 }
   0xa   :  { %408 = vmatpush3.bf16.msra.mxu1 %v437_v20  ;;  %v357_v49 = vld [vmem:[%s613_s4] ss:$0 sm:$0xff] }
   0xb   :  { %409 = vmatprep.subr.bf16.mxu1 %v462_v4  ;;  %v103_v56 = vsub.s32 0, %v102_v55  ;;  %v111_v57 = vsub.s32 2, %v102_v55  ;;  %v99_v58 = vld [vmem:[%s614_s2] sm:$0x7]  ;;  %v107_v59 = vsub.s32 1, %v102_v55 }
   0xc   :  { %249 = vmatpush1.bf16.msra.mxu0 %v436_v19 }
   0xd   :  { %250 = vmatprep.subr.bf16.mxu0 %v438_v21  ;;  %v104_v60 = vrot.slane %v99_v58, %v103_v56  ;;  %v112_v61 = vrot.slane %v99_v58, %v111_v57  ;;  %v108_v62 = vrot.slane %v99_v58, %v107_v59 }
   0xe   :  { %410 = vmatpush3.bf16.msra.mxu1 %v441_v23 }
   0xf   :  { %411 = vmatprep.subr.bf16.mxu1 %v462_v4 }
  0x10   :  { %251 = vmatpush1.bf16.msra.mxu0 %v440_v22 }
  0x11   :  { %252 = vmatprep.subr.bf16.mxu0 %v442_v24 }
  0x12   :  { %412 = vmatpush3.bf16.msra.mxu1 %v445_v26 }
  0x13   :  { %413 = vmatprep.subr.bf16.mxu1 %v462_v4 }
  0x14   :  { %253 = vmatpush1.bf16.msra.mxu0 %v444_v25 }
  0x15   :  { %254 = vmatprep.subr.bf16.mxu0 %v446_v27 }
  0x16   :  { %414 = vmatpush3.bf16.msra.mxu1 %v449_v29 }
  0x17   :  { %415 = vmatprep.subr.bf16.mxu1 %v462_v4 }
  0x18   :  { %255 = vmatpush1.bf16.msra.mxu0 %v448_v28 }
  0x19   :  { %256 = vmatprep.subr.bf16.mxu0 %v450_v30 }
  0x1a   :  { %416 = vmatpush3.bf16.msra.mxu1 %v453_v33 }
  0x1b   :  { %417 = vmatprep.subr.bf16.mxu1 %v462_v4 }
  0x1c   :  { %257 = vmatpush1.bf16.msra.mxu0 %v452_v32 }
  0x1d   :  { %258 = vmatprep.subr.bf16.mxu0 %v454_v34 }
  0x1e   :  { %418 = vmatpush3.bf16.msra.mxu1 %v457_v36 }
  0x20   :  { %259 = vmatpush1.bf16.msra.mxu0 %v456_v35 }
  0x91   :  { %v26_v8 = vpop.xlane.xlu0 %25 }
  0x92   :  { %v30_v9 = vmul.f32 0.0078125, %v26_v8 }
  0x94   :  { %v512_v10 = vsub.f32 %v392_v1, %v30_v9 }
  0x95   :  { %v28_v11 = vpop.xlane.xlu0 %27 }
  0x96   :  { %v31_v12 = vmul.f32 0.0078125, %v28_v11  ;;  %v34_v13 = vmul.f32 %v512_v10, %v512_v10 }
  0x98   :  { %v516_v14 = vsub.f32 %v393_v2, %v31_v12  ;;  %36 = vadd.xlane.f32.xlu1 %v34_v13 }
  0x9a   :  { %v35_v15 = vmul.f32 %v516_v14, %v516_v14 }
  0x9c   :  { %38 = vadd.xlane.f32.xlu1 %v35_v15 }
 0x125   :  { %v37_v37 = vpop.xlane.xlu1 %36 }
 0x126   :  { %v40_v38 = vmul.f32 0.0078125, %v37_v37 }
 0x128   :  { %v42_v39 = vadd.f32 1e-05, %v40_v38 }
 0x129   :  { %v39_v40 = vpop.xlane.xlu1 %38 }
 0x12a   :  { %458 = vrsqrt.f32 %v42_v39  ;;  %v41_v41 = vmul.f32 0.0078125, %v39_v40 }
 0x12c   :  { %v43_v42 = vadd.f32 1e-05, %v41_v41 }
 0x12e   :  { %460 = vrsqrt.f32 %v43_v42 }
 0x134   :  { %v459_v43 = vpop.eup %458 }
 0x135   :  { %v46_v44 = vmul.f32 %v459_v43, %v512_v10 }
 0x137   :  { %v55_v48 = vmul.f32 %v356_v45, %v46_v44 }
 0x138   :  { %v461_v46 = vpop.eup %460 }
 0x139   :  { %v47_v47 = vmul.f32 %v461_v46, %v516_v14  ;;  %v64_v51 = vadd.f32 %v357_v49, %v55_v48 }
 0x13b   :  { %v56_v50 = vmul.f32 %v356_v45, %v47_v47 }
 0x13d   :  { %v65_v52 = vadd.f32 %v357_v49, %v56_v50 }
 0x13f   :  { %v66_v53 = vpack.c.bf16 %v65_v52, %v64_v51 }
 0x141   :  { %277 = vmatmul.mubr.bf16.vlgmr.msra.gmra.mrb[0].mxu0 %v66_v53  ;;  %420 = vmatmul.mubr.bf16.vlgmr.msra.gmra.mrb[0].mxu1 %v66_v53 }
 0x214   :  { %v278_v63 = vpop.f32.mrb[0].mxu0  ;;  %v321_v0 = vpop.f32.mrb[0].mxu1 }
 0x215   :  { %v279_v1 = vadd.f32 %v278_v63, %v104_v60  ;;  %v322_v2 = vadd.f32 %v321_v0, %v112_v61  ;;  %v280_v3 = vpop.f32.mrb[1].mxu0  ;;  %v421_v4 = vpop.f32.mrb[1].mxu1 }
 0x216   :  { %v281_v5 = vadd.f32 %v280_v3, %v108_v62  ;;  %v282_v6 = vpop.f32.mrb[2].mxu0  ;;  %v324_v7 = vpop.f32.mrb[2].mxu1 }
 0x217   :  { %v387_v8 = vpack.c.bf16 %v322_v2, %v322_v2  ;;  %v283_v9 = vadd.f32 %v282_v6, %v104_v60  ;;  %v325_v10 = vadd.f32 %v324_v7, %v112_v61  ;;  %v284_v11 = vpop.f32.mrb[3].mxu0  ;;  %v422_v12 = vpop.f32.mrb[3].mxu1 }
 0x218   :  { %v386_v13 = vpack.c.bf16 %v281_v5, %v279_v1  ;;  %v285_v14 = vadd.f32 %v284_v11, %v108_v62 }
 0x219   :  { %349 = vst [vmem:[%s615_s5 + $0x8] sm:$0xf] %v387_v8  ;;  %v389_v15 = vpack.c.bf16 %v325_v10, %v325_v10 }
 0x21a   :  { %348 = vst [vmem:[%s615_s5] sm:$0xff] %v386_v13  ;;  %v388_v16 = vpack.c.bf16 %v285_v14, %v283_v9 }
 0x21b   :  { %351 = vst [vmem:[%s615_s5 + $0x14] sm:$0xf] %v389_v15 }
 0x21c   :  { %350 = vst [vmem:[%s615_s5 + $0xc] sm:$0xff] %v388_v16 }

// kernel: cagm_forward.12
= control target key start
LH: loop header
LB: loop body
LE: loop exit
PB: predicated region body
PF: predicated region fallthrough
CT: control target
= control target key end

     0   :  { %s1058_s12 = smov 0   ;;  %s1060_s13 = smov 0   ;;  %s1193_s0 = inlined_call_operand.vmem [shape: bf16[2,8,384], index: 0, kind: input, shape index: {}, may-alias: {0,1,2}]   ;;  %s1194_s1 = inlined_call_operand.vmem [shape: bf16[2,8,384], index: 1, kind: input, shape index: {}, may-alias: {0,1,2}]   ;;  %s1195_s2 = inlined_call_operand.vmem [shape: bf16[2,8,384], index: 2, kind: input, shape index: {}, may-alias: {0,1,2}]   ;;  %s1196_s3 = inlined_call_operand.vmem [shape: bf16[2,8,128], index: 3, kind: output, shape index: {}]  }
   0x1   :  { %s1062_s14 = smov 0  }
   0x2 LB: > { %s25_s15 = sadd.s32 1, %s1027_s13  ;;  %p873_p0 = scmp.ge.s32.totalorder %s1031_s14, 1  ;;  %s1031_s14 = sphi %s1062_s14, %s13_s14   ;;  %s1027_s13 = sphi %s1060_s13, %s1198_s13   ;;  %s1023_s12 = sphi %s1058_s12, %s1197_s12  }
   0x3   : > { %p27_p1 = scmp.ge.s32.totalorder %s25_s15, 2  ;;  %p194_p2 = scmp.lt.s32.totalorder %s1031_s14, 3 }
   0x5   : > { %s1200_s15 = smov (%p27_p1, %s25_s15), 0  ;;  %p195_p3 = pnand %p873_p0, %p194_p2 }
   0x6   : > { %p241_p4 = scmp.lt.s32.totalorder (!%p195_p3), %s1023_s12, 1  ;;  %v1033_v0 = vmov (!%p195_p3), 0.0   ;;  %vm1034_vm0 = vmmov (!%p195_p3), 0   ;;  %vm287_vm1 = vcmask (!%p195_p3), 261120   ;;  %v281_v5 = vlaneseq (!%p195_p3)  ;;  %s1035_s24 = smov (!%p195_p3), 96  }
   0x7   : > { %198 = sbr.rel (%p195_p3) target bundleno = 1478 (0x5c6), region = 32  ;;  %911 = vmatprep.subr.bf16.mxu0 (!%p195_p3), %v1033_v0  ;;  %913 = vmatprep.mubr.msk.bf16.mxu0 (!%p195_p3), %vm1034_vm0, %v1033_v0  ;;  %vm335_vm3 = vcmask (!%p195_p3), 64512   ;;  %s1036_s25 = smov (!%p195_p3), 64   ;;  %vm351_vm4 = vcmask (!%p195_p3), 1043456   ;;  %vm750_vm5 = vcmask (!%p195_p3), 523264   ;;  %vm752_vm6 = vcmask (!%p195_p3), 785408  }
   0x8   : > { %917 = vmatprep.subr.bf16.mxu1 (!%p195_p3), %v1033_v0  ;;  %919 = vmatprep.mubr.msk.bf16.mxu1 (!%p195_p3), %vm1034_vm0, %v1033_v0  ;;  %v1100_v6 = vshrl.u32 (!%p195_p3), %v281_v5, 7  ;;  %v1102_v7 = vand.u32 (!%p195_p3), 127, %v281_v5  ;;  %s1037_s26 = smov (!%p195_p3), 32  }
   0xa   : > { %vm285_vm2 = vcmp.le.s32.totalorder (!%p195_p3), %v1102_v7, %v1100_v6 }
   0xe   : > { %s1202_s12 = smov (!%p241_p4, %s1023_s12), 1 }
   0xf   : > { %s1085_s16 = smul.u32 12, %s1202_s12  ;;  %s877_s4 = sshll.u32 %s1202_s12, 2 }
  0x10   : > { %s275_s7 = scalar_lea.vmem %s1196_s3, %s877_s4 }
  0x11   : > { %s892_s17 = sadd.s32 4, %s1085_s16  ;;  %s248_s23 = scalar_lea.vmem %s1193_s0, %s1085_s16 }
  0x12   : > { %s257_s20 = scalar_lea.vmem %s1194_s1, %s892_s17  ;;  %v278_v3 = vld [vmem:[%s248_s23] sm:$0xf]  ;;  %s894_s27 = sadd.s32 8, %s1085_s16 }
  0x13   : > { %v279_v1 = vld [vmem:[%s257_s20] sm:$0xf]  ;;  %v286_v4 = vmul.bf16 1043676725, %v278_v3  ;;  %s267_s30 = scalar_lea.vmem %s1195_s2, %s894_s27 }
  0x14   : > { %v292_v2 = vsel %vm287_vm1, %v279_v1, 0  ;;  %v881_v14 = vcombine.low %v279_v1, %v279_v1  ;;  %v1120_v21 = vld [vmem:[%s267_s30] sm:$0xf] }
  0x15   : > { %912 = vmatpush3.bf16.xpose.msra.mxu0 %v292_v2  ;;  %v880_v15 = vcombine.low %v286_v4, %v286_v4  ;;  %v353_v22 = vsel %vm351_vm4, %v1120_v21, 0  ;;  %v883_v5 = vcombine.low %v1120_v21, %v1120_v21 }
  0x16   : > { %929 = vmatprep.subr.bf16.mxu0 %v1033_v0  ;;  %403 = vrot.lane.b32.xlu1 %v881_v14, %s1035_s24 }
  0x17   : > { %918 = vmatpush3.bf16.msra.mxu1 %v353_v22 }
  0x18   : > { %923 = vmatprep.subr.bf16.mxu1 %v1033_v0 }
  0x1a   : > { %398 = vrot.lane.b32.xlu1 %v880_v15, %s1035_s24 }
  0x1c   : > { %914 = vmatmul.mubr.msk.bf16.vlgmr.msra.gmra.mrb[0].mxu0 %vm287_vm1, %v286_v4 }
  0x1d   : > { %931 = vmatprep.mubr.msk.bf16.mxu0 %vm1034_vm0, %v1033_v0 }
  0x1e   : > { %515 = vrot.lane.b32.xlu1 %v880_v15, %s1036_s25 }
  0x22   : > { %628 = vrot.lane.b32.xlu1 %v881_v14, %s1037_s26 }
  0x26   : > { %626 = vrot.lane.b32.xlu1 %v880_v15, %s1037_s26 }
  0x88   : > { %v404_v25 = vpop.permute.xlu1 %403 }
  0x89   : > { %v409_v27 = vsel %vm287_vm1, %v404_v25, 0 }
  0x8c   : > { %v399_v29 = vpop.permute.xlu1 %398 }
  0x90   : > { %v516_v31 = vpop.permute.xlu1 %515 }
  0x94   : > { %v629_v33 = vpop.permute.xlu1 %628 }
  0x95   : > { %v634_v34 = vsel %vm287_vm1, %v629_v33, 0 }
  0x98   : > { %v627_v35 = vpop.permute.xlu1 %626 }
  0xef   : > { %v328_v8 = vpop.f32.mrb[0].mxu0 }
  0xf0   : > { %v334_v9 = vsel %vm285_vm2, %v328_v8, -1e+30  ;;  %v915_v10 = vpop.f32.mrb[1].mxu0 }
  0xf1   : > { %v331_v11 = vpop.f32.mrb[2].mxu0  ;;  %v336_v12 = vsel %vm335_vm3, %v334_v9, -inf }
  0xf2   : > { %337 = vmax.xlane.f32.xlu0 %v336_v12  ;;  %v916_v13 = vpop.f32.mrb[3].mxu0 }
 0x17f   : > { %v338_v16 = vpop.xlane.xlu0 %337 }
 0x180   : > { %v339_v17 = vsub.f32 %v334_v9, %v338_v16 }
 0x182   : > { %v340_v18 = vmul.f32 1.442695, %v339_v17 }
 0x184   : > { %993 = vpow2.f32 %v340_v18 }
 0x18e   : > { %v994_v19 = vpop.eup %993 }
 0x18f   : > { %v342_v20 = vsel %vm335_vm3, %v994_v19, 0.0 }
 0x190   : > { %343 = vadd.xlane.f32.xlu0 %v342_v20 }
 0x1a6   : > { %517 = vrot.lane.b32.xlu0 %v881_v14, %s1036_s25 }
 0x21d   : > { %v344_v23 = vpop.xlane.xlu0 %343 }
 0x21e   : > { %995 = vrcp.f32 %v344_v23 }
 0x221   : > { %v518_v30 = vpop.permute.xlu0 %517 }
 0x222   : > { %v523_v32 = vsel %vm287_vm1, %v518_v30, 0 }
 0x228   : > { %v996_v24 = vpop.eup %995 }
 0x229   : > { %v346_v26 = vmul.f32 %v996_v24, %v994_v19 }
 0x22b   : > { %v347_v28 = vpack.c.bf16 %v346_v26, %v346_v26 }
 0x22d   : > { %920 = vmatmul.mubr.msk.bf16.vlgmr.msra.gmra.mrb[0].mxu1 %vm335_vm3, %v347_v28 }
 0x22e   : > { %924 = vmatpush3.bf16.xpose.msra.mxu1 %v409_v27  ;;  %925 = vmatprep.mubr.msk.bf16.mxu1 %vm1034_vm0, %v1033_v0 }
 0x22f   : > { %935 = vmatprep.subr.bf16.mxu1 %v1033_v0 }
 0x235   : > { %926 = vmatmul.mubr.msk.bf16.vlgmr.msra.gmra.mrb[4].mxu1 %vm287_vm1, %v399_v29 }
 0x236   : > { %936 = vmatpush3.bf16.xpose.msra.mxu1 %v523_v32  ;;  %937 = vmatprep.mubr.msk.bf16.mxu1 %vm1034_vm0, %v1033_v0 }
 0x237   : > { %947 = vmatprep.subr.bf16.mxu1 %v1033_v0 }
 0x23d   : > { %938 = vmatmul.mubr.msk.bf16.vlgmr.msra.gmra.mrb[8].mxu1 %vm287_vm1, %v516_v31 }
 0x23e   : > { %948 = vmatpush3.bf16.xpose.msra.mxu1 %v634_v34  ;;  %949 = vmatprep.mubr.msk.bf16.mxu1 %vm1034_vm0, %v1033_v0 }
 0x245   : > { %950 = vmatmul.mubr.msk.bf16.vlgmr.msra.gmra.mrb[12].mxu1 %vm287_vm1, %v627_v35 }
 0x300   : > { %v1141_v36 = vpop.f32.mrb[0].mxu1 }
 0x301   : > { %v921_v37 = vpop.f32.mrb[1].mxu1 }
 0x302   : > { %v392_v38 = vpop.f32.mrb[2].mxu1 }
 0x303   : > { %v922_v39 = vpop.f32.mrb[3].mxu1 }
 0x308   : > { %v445_v40 = vpop.f32.mrb[4].mxu1 }
 0x309   : > { %v451_v41 = vsel %vm285_vm2, %v445_v40, -1e+30  ;;  %v927_v42 = vpop.f32.mrb[5].mxu1 }
 0x30a   : > { %v448_v43 = vpop.f32.mrb[6].mxu1  ;;  %v452_v44 = vsel %vm335_vm3, %v451_v41, -inf }
 0x30b   : > { %453 = vmax.xlane.f32.xlu1 %v452_v44  ;;  %v928_v45 = vpop.f32.mrb[7].mxu1 }
 0x310   : > { %v559_v46 = vpop.f32.mrb[8].mxu1 }
 0x311   : > { %v565_v47 = vsel %vm285_vm2, %v559_v46, -1e+30  ;;  %v939_v48 = vpop.f32.mrb[9].mxu1 }
 0x312   : > { %v566_v49 = vsel %vm335_vm3, %v565_v47, -inf  ;;  %v562_v50 = vpop.f32.mrb[10].mxu1 }
 0x313   : > { %567 = vmax.xlane.f32.xlu0 %v566_v49  ;;  %v940_v51 = vpop.f32.mrb[11].mxu1 }
 0x318   : > { %v670_v52 = vpop.f32.mrb[12].mxu1 }
 0x319   : > { %v676_v53 = vsel %vm285_vm2, %v670_v52, -1e+30  ;;  %v951_v54 = vpop.f32.mrb[13].mxu1 }
 0x31a   : > { %v677_v55 = vsel %vm335_vm3, %v676_v53, -inf  ;;  %v673_v56 = vpop.f32.mrb[14].mxu1 }
 0x31b   : > { %678 = vmax.xlane.f32.xlu1 %v677_v55  ;;  %v952_v57 = vpop.f32.mrb[15].mxu1 }
 0x398   : > { %v454_v58 = vpop.xlane.xlu1 %453 }
 0x399   : > { %v455_v59 = vsub.f32 %v451_v41, %v454_v58 }
 0x39b   : > { %v456_v60 = vmul.f32 1.442695, %v455_v59 }
 0x39d   : > { %997 = vpow2.f32 %v456_v60 }
 0x3a0   : > { %v568_v61 = vpop.xlane.xlu0 %567 }
 0x3a1   : > { %v569_v62 = vsub.f32 %v565_v47, %v568_v61 }
 0x3a3   : > { %v570_v63 = vmul.f32 1.442695, %v569_v62 }
 0x3a5   : > { %999 = vpow2.f32 %v570_v63 }
 0x3a7   : > { %v998_v1 = vpop.eup %997 }
 0x3a8   : > { %v458_v2 = vsel %vm335_vm3, %v998_v1, 0.0  ;;  %v679_v6 = vpop.xlane.xlu1 %678 }
 0x3a9   : > { %459 = vadd.xlane.f32.xlu1 %v458_v2  ;;  %v680_v7 = vsub.f32 %v676_v53, %v679_v6 }
 0x3ab   : > { %v681_v8 = vmul.f32 1.442695, %v680_v7 }
 0x3ad   : > { %1001 = vpow2.f32 %v681_v8 }
 0x3af   : > { %v1000_v3 = vpop.eup %999 }
 0x3b0   : > { %v572_v4 = vsel %vm335_vm3, %v1000_v3, 0.0 }
 0x3b1   : > { %573 = vadd.xlane.f32.xlu0 %v572_v4 }
 0x3b7   : > { %v1002_v9 = vpop.eup %1001 }
 0x3b8   : > { %v683_v10 = vsel %vm335_vm3, %v1002_v9, 0.0 }
 0x3ba   : > { %578 = vrot.lane.b32.xlu1 %v883_v5, %s1036_s25 }
 0x3c7   : > { %467 = vrot.lane.b32.xlu0 %v883_v5, %s1035_s24 }
 0x3de   : > { %684 = vadd.xlane.f32.xlu1 %v683_v10 }
 0x3ef   : > { %689 = vrot.lane.b32.xlu1 %v883_v5, %s1037_s26 }
 0x436   : > { %v460_v11 = vpop.xlane.xlu1 %459 }
 0x437   : > { %1003 = vrcp.f32 %v460_v11 }
 0x43a   : > { %v579_v17 = vpop.permute.xlu1 %578 }
 0x43b   : > { %v584_v19 = vsel %vm351_vm4, %v579_v17, 0 }
 0x43e   : > { %v574_v12 = vpop.xlane.xlu0 %573 }
 0x43f   : > { %1005 = vrcp.f32 %v574_v12 }
 0x441   : > { %v1004_v13 = vpop.eup %1003 }
 0x442   : > { %v462_v14 = vmul.f32 %v1004_v13, %v998_v1  ;;  %v468_v15 = vpop.permute.xlu0 %467 }
 0x443   : > { %v473_v16 = vsel %vm351_vm4, %v468_v15, 0 }
 0x444   : > { %930 = vmatpush3.bf16.msra.mxu0 %v473_v16  ;;  %v463_v18 = vpack.c.bf16 %v462_v14, %v462_v14 }
 0x445   : > { %941 = vmatprep.subr.bf16.mxu0 %v1033_v0 }
 0x447   : > { %932 = vmatmul.mubr.msk.bf16.vlgmr.msra.gmra.mrb[4].mxu0 %vm335_vm3, %v463_v18 }
 0x448   : > { %942 = vmatpush3.bf16.msra.mxu0 %v584_v19  ;;  %943 = vmatprep.mubr.msk.bf16.mxu0 %vm1034_vm0, %v1033_v0 }
 0x449   : > { %v1006_v20 = vpop.eup %1005  ;;  %953 = vmatprep.subr.bf16.mxu0 %v1033_v0 }
 0x44a   : > { %v576_v21 = vmul.f32 %v1006_v20, %v1000_v3 }
 0x44c   : > { %v577_v22 = vpack.c.bf16 %v576_v21, %v576_v21 }
 0x44f   : > { %944 = vmatmul.mubr.msk.bf16.vlgmr.msra.gmra.mrb[8].mxu0 %vm335_vm3, %v577_v22 }
 0x450   : > { %955 = vmatprep.mubr.msk.bf16.mxu0 %vm1034_vm0, %v1033_v0 }
 0x46b   : > { %v685_v23 = vpop.xlane.xlu1 %684 }
 0x46c   : > { %1007 = vrcp.f32 %v685_v23 }
 0x46f   : > { %v690_v24 = vpop.permute.xlu1 %689 }
 0x470   : > { %v695_v25 = vsel %vm351_vm4, %v690_v24, 0 }
 0x471   : > { %954 = vmatpush3.bf16.msra.mxu0 %v695_v25 }
 0x476   : > { %v1008_v26 = vpop.eup %1007 }
 0x477   : > { %v687_v27 = vmul.f32 %v1008_v26, %v1002_v9 }
 0x479   : > { %v688_v28 = vpack.c.bf16 %v687_v27, %v687_v27 }
 0x47b   : > { %956 = vmatmul.mubr.msk.bf16.vlgmr.msra.gmra.mrb[12].mxu0 %vm335_vm3, %v688_v28 }
 0x51a   : > { %v509_v29 = vpop.f32.mrb[4].mxu0 }
 0x51b   : > { %738 = vrot.lane.b32.xlu0 %v509_v29, %s1037_s26  ;;  %v933_v30 = vpop.f32.mrb[5].mxu0 }
 0x51c   : > { %v512_v31 = vpop.f32.mrb[6].mxu0 }
 0x51d   : > { %v934_v32 = vpop.f32.mrb[7].mxu0 }
 0x522   : > { %v620_v33 = vpop.f32.mrb[8].mxu0 }
 0x523   : > { %742 = vrot.lane.b32.xlu1 %v620_v33, %s1036_s25  ;;  %v945_v0 = vpop.f32.mrb[9].mxu0 }
 0x524   : > { %v623_v34 = vpop.f32.mrb[10].mxu0 }
 0x525   : > { %v946_v35 = vpop.f32.mrb[11].mxu0 }
 0x54e   : > { %v731_v37 = vpop.f32.mrb[12].mxu0 }
 0x54f   : > { %746 = vrot.lane.b32.xlu0 %v731_v37, %s1035_s24  ;;  %v957_v38 = vpop.f32.mrb[13].mxu0 }
 0x550   : > { %v734_v39 = vpop.f32.mrb[14].mxu0 }
 0x551   : > { %v958_v40 = vpop.f32.mrb[15].mxu0 }
 0x58d   : > { %v739_v41 = vpop.permute.xlu0 %738 }
 0x58e   : > { %v749_v43 = vsel %vm287_vm1, %v1141_v36, %v739_v41 }
 0x595   : > { %v743_v42 = vpop.permute.xlu1 %742 }
 0x596   : > { %v751_v44 = vsel %vm750_vm5, %v749_v43, %v743_v42 }
 0x5c1   : > { %v747_v45 = vpop.permute.xlu0 %746 }
 0x5c2   : > { %v753_v46 = vsel %vm752_vm6, %v751_v44, %v747_v45 }
 0x5c3   : > { %v754_v47 = vpack.c.bf16 %v753_v46, %v753_v46 }
 0x5c5   : > { %755 = vst [vmem:[%s275_s7] sm:$0xf] %v754_v47 }
 0x5c6 PF: > { %s13_s14 = sadd.s32 1, %s1031_s14   ;;  %s1197_s12 = smov %s1027_s13 }
 0x5c7   : > { %p10_p5 = scmp.ge.s32.totalorder %s13_s14, 4   ;;  %s1198_s13 = smov %s1200_s15 }
 0x5c9   :  { %12 = sbr.rel (!%p10_p5) target bundleno = 2 (0x2), region = 68 }

// kernel: cagm_forward.14
= control target key start
LH: loop header
LB: loop body
LE: loop exit
PB: predicated region body
PF: predicated region fallthrough
CT: control target
= control target key end

     0   :  { %v586_v37 = vmov 0   ;;  %v101_v61 = vlaneseq  ;;  %s803_s0 = inlined_call_operand.vmem [shape: bf16[16,128], index: 0, kind: input, shape index: {}]   ;;  %s804_s1 = inlined_call_operand.vmem [shape: bf16[128,512], index: 1, kind: input, shape index: {}]   ;;  %s805_s3 = inlined_call_operand.vmem [shape: f32[1,128], index: 3, kind: input, shape index: {}]   ;;  %s806_s4 = inlined_call_operand.vmem [shape: f32[1,128], index: 4, kind: input, shape index: {}]   ;;  %s807_s2 = inlined_call_operand.vmem [shape: f32[1,512], index: 2, kind: input, shape index: {}]   ;;  %s808_s5 = inlined_call_operand.vmem [shape: bf16[16,512], index: 5, kind: output, shape index: {}]  }
   0x1   :  { %v514_v0 = vld [vmem:[%s803_s0] sm:$0xff]   ;;  %v520_v4 = vld [vmem:[%s804_s1 + $0xc] ss:$16 sps:$4 sm:$0xff]   ;;  %v523_v6 = vld [vmem:[%s804_s1 + $0x8] ss:$16 sps:$4 sm:$0xff]   ;;  %313 = vmatprep.mubr.bf16.mxu0 %v586_v37  ;;  %356 = vmatprep.mubr.bf16.mxu1 %v586_v37 }
   0x2   :  { %v515_v1 = vunpack.c.l.bf16 %v514_v0  ;;  %v516_v2 = vunpack.c.h.bf16 %v514_v0  ;;  %v518_v3 = vld [vmem:[%s804_s1 + $0x4] ss:$16 sps:$4 sm:$0xff]   ;;  %v522_v5 = vld [vmem:[%s804_s1] ss:$16 sps:$4 sm:$0xff]   ;;  %324 = vmatprep.subr.bf16.mxu1 %v520_v4  ;;  %v526_v8 = vld [vmem:[%s804_s1 + $0x2c] ss:$16 sps:$4 sm:$0xff]  }
   0x3   :  { %281 = vmatprep.subr.bf16.mxu0 %v518_v3  ;;  %v524_v7 = vld [vmem:[%s804_s1 + $0x24] ss:$16 sps:$4 sm:$0xff]   ;;  %325 = vmatpush1.bf16.msra.mxu1 %v523_v6  ;;  %v528_v17 = vld [vmem:[%s804_s1 + $0x20] ss:$16 sps:$4 sm:$0xff]   ;;  %v529_v18 = vld [vmem:[%s804_s1 + $0x28] ss:$16 sps:$4 sm:$0xff]  }
   0x4   :  { %25 = vadd.xlane.f32.xlu0 %v515_v1  ;;  %282 = vmatpush1.bf16.msra.mxu0 %v522_v5  ;;  %v530_v19 = vld [vmem:[%s804_s1 + $0x44] ss:$16 sps:$4 sm:$0xff]   ;;  %v532_v20 = vld [vmem:[%s804_s1 + $0x4c] ss:$16 sps:$4 sm:$0xff]   ;;  %v534_v21 = vld [vmem:[%s804_s1 + $0x40] ss:$16 sps:$4 sm:$0xff]  }
   0x5   :  { %283 = vmatprep.subr.bf16.mxu0 %v524_v7  ;;  %326 = vmatprep.subr.bf16.mxu1 %v526_v8  ;;  %v535_v22 = vld [vmem:[%s804_s1 + $0x48] ss:$16 sps:$4 sm:$0xff]   ;;  %v536_v23 = vld [vmem:[%s804_s1 + $0x64] ss:$16 sps:$4 sm:$0xff]   ;;  %v538_v24 = vld [vmem:[%s804_s1 + $0x6c] ss:$16 sps:$4 sm:$0xff]  }
   0x6   :  { %v540_v25 = vld [vmem:[%s804_s1 + $0x60] ss:$16 sps:$4 sm:$0xff]   ;;  %v541_v26 = vld [vmem:[%s804_s1 + $0x68] ss:$16 sps:$4 sm:$0xff]   ;;  %v542_v27 = vld [vmem:[%s804_s1 + $0x84] ss:$16 sps:$4 sm:$0xff]  }
   0x7   :  { %327 = vmatpush1.bf16.msra.mxu1 %v529_v18  ;;  %v544_v28 = vld [vmem:[%s804_s1 + $0x8c] ss:$16 sps:$4 sm:$0xff]   ;;  %v546_v29 = vld [vmem:[%s804_s1 + $0x80] ss:$16 sps:$4 sm:$0xff]   ;;  %v547_v30 = vld [vmem:[%s804_s1 + $0x88] ss:$16 sps:$4 sm:$0xff]  }
   0x8   :  { %27 = vadd.xlane.f32.xlu0 %v516_v2  ;;  %284 = vmatpush1.bf16.msra.mxu0 %v528_v17  ;;  %v548_v31 = vld [vmem:[%s804_s1 + $0xa4] ss:$16 sps:$4 sm:$0xff]   ;;  %v550_v32 = vld [vmem:[%s804_s1 + $0xac] ss:$16 sps:$4 sm:$0xff]   ;;  %v552_v33 = vld [vmem:[%s804_s1 + $0xa0] ss:$16 sps:$4 sm:$0xff]  }
   0x9   :  { %285 = vmatprep.subr.bf16.mxu0 %v530_v19  ;;  %328 = vmatprep.subr.bf16.mxu1 %v532_v20  ;;  %v553_v34 = vld [vmem:[%s804_s1 + $0xa8] ss:$16 sps:$4 sm:$0xff]   ;;  %v554_v35 = vld [vmem:[%s804_s1 + $0xc4] ss:$16 sps:$4 sm:$0xff]   ;;  %v556_v36 = vld [vmem:[%s804_s1 + $0xcc] ss:$16 sps:$4 sm:$0xff]  }
   0xa   :  { %v558_v38 = vld [vmem:[%s804_s1 + $0xc0] ss:$16 sps:$4 sm:$0xff]   ;;  %v559_v39 = vld [vmem:[%s804_s1 + $0xc8] ss:$16 sps:$4 sm:$0xff]   ;;  %v560_v40 = vld [vmem:[%s804_s1 + $0xe4] ss:$16 sps:$4 sm:$0xff]  }
   0xb   :  { %329 = vmatpush1.bf16.msra.mxu1 %v535_v22  ;;  %v562_v41 = vld [vmem:[%s804_s1 + $0xec] ss:$16 sps:$4 sm:$0xff]   ;;  %v564_v42 = vld [vmem:[%s804_s1 + $0xe0] ss:$16 sps:$4 sm:$0xff]   ;;  %v565_v43 = vld [vmem:[%s804_s1 + $0xe8] ss:$16 sps:$4 sm:$0xff]  }
   0xc   :  { %286 = vmatpush1.bf16.msra.mxu0 %v534_v21  ;;  %330 = vmatprep.subr.bf16.mxu1 %v538_v24  ;;  %v471_v52 = vld [vmem:[%s805_s3] ss:$0 sm:$0xff]  ;;  %v102_v62 = vshrl.u32 %v101_v61, 7 }
   0xd   :  { %287 = vmatprep.subr.bf16.mxu0 %v536_v23  ;;  %v472_v56 = vld [vmem:[%s806_s4] ss:$0 sm:$0xff] }
   0xe   :  { %v103_v63 = vsub.s32 0, %v102_v62  ;;  %v111_v0 = vsub.s32 2, %v102_v62  ;;  %v115_v3 = vsub.s32 3, %v102_v62 }
   0xf   :  { %331 = vmatpush1.bf16.msra.mxu1 %v541_v26 }
  0x10   :  { %288 = vmatpush1.bf16.msra.mxu0 %v540_v25  ;;  %332 = vmatprep.subr.bf16.mxu1 %v544_v28 }
  0x11   :  { %289 = vmatprep.subr.bf16.mxu0 %v542_v27 }
  0x13   :  { %333 = vmatpush1.bf16.msra.mxu1 %v547_v30 }
  0x14   :  { %290 = vmatpush1.bf16.msra.mxu0 %v546_v29  ;;  %334 = vmatprep.subr.bf16.mxu1 %v550_v32 }
  0x15   :  { %291 = vmatprep.subr.bf16.mxu0 %v548_v31 }
  0x17   :  { %335 = vmatpush1.bf16.msra.mxu1 %v553_v34 }
  0x18   :  { %292 = vmatpush1.bf16.msra.mxu0 %v552_v33  ;;  %336 = vmatprep.subr.bf16.mxu1 %v556_v36 }
  0x19   :  { %293 = vmatprep.subr.bf16.mxu0 %v554_v35 }
  0x1b   :  { %337 = vmatpush1.bf16.msra.mxu1 %v559_v39 }
  0x1c   :  { %294 = vmatpush1.bf16.msra.mxu0 %v558_v38  ;;  %338 = vmatprep.subr.bf16.mxu1 %v562_v41 }
  0x1d   :  { %295 = vmatprep.subr.bf16.mxu0 %v560_v40 }
  0x1f   :  { %339 = vmatpush1.bf16.msra.mxu1 %v565_v43 }
  0x20   :  { %296 = vmatpush1.bf16.msra.mxu0 %v564_v42 }
  0x91   :  { %v26_v9 = vpop.xlane.xlu0 %25 }
  0x92   :  { %v30_v10 = vmul.f32 0.0078125, %v26_v9 }
  0x94   :  { %v638_v11 = vsub.f32 %v515_v1, %v30_v10  ;;  %v99_v1 = vld [vmem:[%s807_s2] sm:$0xf] }
  0x95   :  { %v28_v12 = vpop.xlane.xlu0 %27  ;;  %v104_v4 = vrot.slane %v99_v1, %v103_v63  ;;  %v112_v5 = vrot.slane %v99_v1, %v111_v0  ;;  %v116_v7 = vrot.slane %v99_v1, %v115_v3 }
  0x96   :  { %v31_v13 = vmul.f32 0.0078125, %v28_v12  ;;  %v34_v14 = vmul.f32 %v638_v11, %v638_v11 }
  0x98   :  { %v642_v15 = vsub.f32 %v516_v2, %v31_v13  ;;  %36 = vadd.xlane.f32.xlu1 %v34_v14  ;;  %v107_v2 = vsub.s32 1, %v102_v62 }
  0x9a   :  { %v35_v16 = vmul.f32 %v642_v15, %v642_v15  ;;  %v108_v6 = vrot.slane %v99_v1, %v107_v2 }
  0x9c   :  { %38 = vadd.xlane.f32.xlu1 %v35_v16 }
 0x125   :  { %v37_v44 = vpop.xlane.xlu1 %36 }
 0x126   :  { %v40_v45 = vmul.f32 0.0078125, %v37_v44 }
 0x128   :  { %v42_v46 = vadd.f32 1e-05, %v40_v45 }
 0x129   :  { %v39_v47 = vpop.xlane.xlu1 %38 }
 0x12a   :  { %566 = vrsqrt.f32 %v42_v46  ;;  %v41_v48 = vmul.f32 0.0078125, %v39_v47 }
 0x12c   :  { %v43_v49 = vadd.f32 1e-05, %v41_v48 }
 0x12e   :  { %568 = vrsqrt.f32 %v43_v49 }
 0x134   :  { %v567_v50 = vpop.eup %566 }
 0x135   :  { %v46_v51 = vmul.f32 %v567_v50, %v638_v11 }
 0x137   :  { %v55_v55 = vmul.f32 %v471_v52, %v46_v51 }
 0x138   :  { %v569_v53 = vpop.eup %568 }
 0x139   :  { %v47_v54 = vmul.f32 %v569_v53, %v642_v15  ;;  %v64_v58 = vadd.f32 %v472_v56, %v55_v55 }
 0x13b   :  { %v56_v57 = vmul.f32 %v471_v52, %v47_v54 }
 0x13d   :  { %v65_v59 = vadd.f32 %v472_v56, %v56_v57 }
 0x13f   :  { %v66_v60 = vpack.c.bf16 %v65_v59, %v64_v58 }
 0x141   :  { %314 = vmatmul.mubr.bf16.vlgmr.msra.gmra.mrb[0].mxu0 %v66_v60  ;;  %357 = vmatmul.mubr.bf16.vlgmr.msra.gmra.mrb[0].mxu1 %v66_v60 }
 0x214   :  { %v315_v8 = vpop.f32.mrb[0].mxu0  ;;  %v358_v9 = vpop.f32.mrb[0].mxu1 }
 0x215   :  { %v735_v10 = vadd.f32 %v315_v8, %v104_v4  ;;  %v737_v11 = vadd.f32 %v358_v9, %v112_v5  ;;  %v317_v12 = vpop.f32.mrb[1].mxu0  ;;  %v360_v13 = vpop.f32.mrb[1].mxu1 }
 0x216   :  { %v739_v14 = vadd.f32 %v317_v12, %v108_v6  ;;  %v741_v15 = vadd.f32 %v360_v13, %v116_v7  ;;  %v319_v16 = vpop.f32.mrb[2].mxu0  ;;  %v362_v17 = vpop.f32.mrb[2].mxu1 }
 0x217   :  { %v375_v18 = vmul.f32 %v735_v10, %v735_v10  ;;  %v377_v19 = vmul.f32 %v737_v11, %v737_v11  ;;  %v321_v20 = vpop.f32.mrb[3].mxu0  ;;  %v364_v21 = vpop.f32.mrb[3].mxu1  ;;  %v753_v26 = vadd.f32 %v319_v16, %v104_v4  ;;  %v755_v27 = vadd.f32 %v362_v17, %v112_v5 }
 0x218   :  { %v376_v22 = vmul.f32 %v739_v14, %v739_v14  ;;  %v378_v23 = vmul.f32 %v741_v15, %v741_v15  ;;  %v759_v30 = vadd.f32 %v321_v20, %v108_v6  ;;  %v763_v34 = vadd.f32 %v364_v21, %v116_v7 }
 0x219   :  { %v383_v24 = vmul.f32 %v375_v18, %v735_v10  ;;  %v385_v25 = vmul.f32 %v377_v19, %v737_v11  ;;  %v379_v33 = vmul.f32 %v753_v26, %v753_v26  ;;  %v381_v37 = vmul.f32 %v755_v27, %v755_v27 }
 0x21a   :  { %v384_v28 = vmul.f32 %v376_v22, %v739_v14  ;;  %v386_v29 = vmul.f32 %v378_v23, %v741_v15  ;;  %v380_v44 = vmul.f32 %v759_v30, %v759_v30  ;;  %v382_v48 = vmul.f32 %v763_v34, %v763_v34 }
 0x21b   :  { %v391_v31 = vmul.f32 0.044715, %v383_v24  ;;  %v393_v32 = vmul.f32 0.044715, %v385_v25  ;;  %v387_v40 = vmul.f32 %v379_v33, %v753_v26  ;;  %v389_v43 = vmul.f32 %v381_v37, %v755_v27 }
 0x21c   :  { %v392_v35 = vmul.f32 0.044715, %v384_v28  ;;  %v394_v36 = vmul.f32 0.044715, %v386_v29  ;;  %v388_v52 = vmul.f32 %v380_v44, %v759_v30  ;;  %v390_v54 = vmul.f32 %v382_v48, %v763_v34 }
 0x21d   :  { %v399_v38 = vadd.f32 %v391_v31, %v735_v10  ;;  %v401_v39 = vadd.f32 %v393_v32, %v737_v11  ;;  %v395_v47 = vmul.f32 0.044715, %v387_v40  ;;  %v397_v51 = vmul.f32 0.044715, %v389_v43 }
 0x21e   :  { %v400_v41 = vadd.f32 %v392_v35, %v739_v14  ;;  %v402_v42 = vadd.f32 %v394_v36, %v741_v15  ;;  %v396_v56 = vmul.f32 0.044715, %v388_v52  ;;  %v398_v58 = vmul.f32 0.044715, %v390_v54 }
 0x21f   :  { %v407_v45 = vmul.f32 0.7978846, %v399_v38  ;;  %v409_v46 = vmul.f32 0.7978846, %v401_v39  ;;  %v403_v53 = vadd.f32 %v395_v47, %v753_v26  ;;  %v405_v55 = vadd.f32 %v397_v51, %v755_v27 }
 0x220   :  { %v408_v49 = vmul.f32 0.7978846, %v400_v41  ;;  %v410_v50 = vmul.f32 0.7978846, %v402_v42  ;;  %v404_v60 = vadd.f32 %v396_v56, %v759_v30  ;;  %v406_v61 = vadd.f32 %v398_v58, %v763_v34 }
 0x221   :  { %570 = vtanh.f32 %v407_v45  ;;  %v411_v57 = vmul.f32 0.7978846, %v403_v53  ;;  %v413_v59 = vmul.f32 0.7978846, %v405_v55  ;;  %v367_v2 = vmul.f32 0.5, %v735_v10 }
 0x222   :  { %572 = vtanh.f32 %v409_v46  ;;  %v412_v62 = vmul.f32 0.7978846, %v404_v60  ;;  %v414_v63 = vmul.f32 0.7978846, %v406_v61  ;;  %v369_v5 = vmul.f32 0.5, %v737_v11 }
 0x223   :  { %574 = vtanh.f32 %v408_v49  ;;  %v368_v9 = vmul.f32 0.5, %v739_v14  ;;  %v370_v17 = vmul.f32 0.5, %v741_v15  ;;  %v371_v10 = vmul.f32 0.5, %v753_v26 }
 0x224   :  { %576 = vtanh.f32 %v410_v50  ;;  %v373_v25 = vmul.f32 0.5, %v755_v27  ;;  %v372_v31 = vmul.f32 0.5, %v759_v30  ;;  %v374_v33 = vmul.f32 0.5, %v763_v34 }
 0x225   :  { %578 = vtanh.f32 %v411_v57 }
 0x226   :  { %580 = vtanh.f32 %v413_v59 }
 0x227   :  { %582 = vtanh.f32 %v412_v62 }
 0x228   :  { %584 = vtanh.f32 %v414_v63 }
 0x22b   :  { %v571_v0 = vpop.eup %570 }
 0x22c   :  { %v573_v1 = vpop.eup %572  ;;  %v423_v3 = vadd.f32 1.0, %v571_v0 }
 0x22d   :  { %v575_v4 = vpop.eup %574  ;;  %v425_v6 = vadd.f32 1.0, %v573_v1 }
 0x22e   :  { %v577_v7 = vpop.eup %576  ;;  %v431_v8 = vmul.f32 %v423_v3, %v367_v2  ;;  %v424_v12 = vadd.f32 1.0, %v575_v4 }
 0x22f   :  { %v579_v13 = vpop.eup %578  ;;  %v433_v16 = vmul.f32 %v425_v6, %v369_v5  ;;  %v426_v18 = vadd.f32 1.0, %v577_v7 }
 0x230   :  { %v581_v19 = vpop.eup %580  ;;  %v432_v20 = vmul.f32 %v424_v12, %v368_v9  ;;  %v427_v21 = vadd.f32 1.0, %v579_v13 }
 0x231   :  { %v434_v22 = vmul.f32 %v426_v18, %v370_v17  ;;  %v429_v23 = vadd.f32 1.0, %v581_v19  ;;  %v583_v24 = vpop.eup %582 }
 0x232   :  { %v509_v11 = vpack.c.bf16 %v432_v20, %v431_v8  ;;  %v585_v28 = vpop.eup %584  ;;  %v435_v14 = vmul.f32 %v427_v21, %v371_v10  ;;  %v428_v32 = vadd.f32 1.0, %v583_v24 }
 0x233   :  { %v510_v29 = vpack.c.bf16 %v434_v22, %v433_v16  ;;  %v437_v15 = vmul.f32 %v429_v23, %v373_v25  ;;  %v430_v35 = vadd.f32 1.0, %v585_v28 }
 0x234   :  { %463 = vst [vmem:[%s808_s5] sm:$0xff] %v509_v11  ;;  %v436_v26 = vmul.f32 %v428_v32, %v372_v31 }
 0x235   :  { %464 = vst [vmem:[%s808_s5 + $0x8] sm:$0xff] %v510_v29  ;;  %v438_v27 = vmul.f32 %v430_v35, %v374_v33 }
 0x236   :  { %v511_v36 = vpack.c.bf16 %v436_v26, %v435_v14 }
 0x237   :  { %v512_v37 = vpack.c.bf16 %v438_v27, %v437_v15 }
 0x238   :  { %465 = vst [vmem:[%s808_s5 + $0x10] sm:$0xff] %v511_v36 }
 0x239   :  { %466 = vst [vmem:[%s808_s5 + $0x18] sm:$0xff] %v512_v37 }

// kernel: cagm_forward.15
= control target key start
LH: loop header
LB: loop body
LE: loop exit
PB: predicated region body
PF: predicated region fallthrough
CT: control target
= control target key end

     0   :  { %s681_s1 = inlined_call_operand.vmem [shape: bf16[512,128], index: 1, kind: input, shape index: {}]   ;;  %s682_s0 = inlined_call_operand.vmem [shape: bf16[16,512], index: 0, kind: input, shape index: {}]   ;;  %s683_s2 = inlined_call_operand.vmem [shape: f32[1,128], index: 2, kind: input, shape index: {}]   ;;  %s684_s3 = inlined_call_operand.vmem [shape: bf16[16,128], index: 3, kind: input, shape index: {}]   ;;  %s685_s4 = inlined_call_operand.vmem [shape: bf16[16,128], index: 4, kind: output, shape index: {}]  }
   0x1   :  { %v501_v0 = vld [vmem:[%s681_s1 + $0x40] sm:$0xff]   ;;  %v505_v4 = vld [vmem:[%s681_s1 + $0x48] sm:$0xff]   ;;  %v509_v8 = vld [vmem:[%s681_s1 + $0x50] sm:$0xff]  }
   0x2   :  { %v502_v1 = vld [vmem:[%s681_s1 + $0xc0] sm:$0xff]   ;;  %457 = vmatprep.subr.bf16.mxu0 %v501_v0  ;;  %v506_v5 = vld [vmem:[%s681_s1 + $0xc8] sm:$0xff]   ;;  %v510_v9 = vld [vmem:[%s681_s1 + $0xd0] sm:$0xff]  }
   0x3   :  { %v503_v2 = vld [vmem:[%s681_s1] sm:$0xff]   ;;  %479 = vmatprep.subr.bf16.mxu1 %v502_v1  ;;  %v507_v6 = vld [vmem:[%s681_s1 + $0x8] sm:$0xff]   ;;  %v511_v10 = vld [vmem:[%s681_s1 + $0x10] sm:$0xff]  }
   0x4   :  { %v504_v3 = vld [vmem:[%s681_s1 + $0x80] sm:$0xff]   ;;  %458 = vmatpush3.bf16.msra.mxu0 %v503_v2  ;;  %v508_v7 = vld [vmem:[%s681_s1 + $0x88] sm:$0xff]   ;;  %v512_v11 = vld [vmem:[%s681_s1 + $0x90] sm:$0xff]  }
   0x5   :  { %480 = vmatpush3.bf16.msra.mxu1 %v504_v3  ;;  %459 = vmatprep.subr.bf16.mxu0 %v505_v4  ;;  %v513_v12 = vld [vmem:[%s681_s1 + $0x58] sm:$0xff]   ;;  %v517_v16 = vld [vmem:[%s681_s1 + $0x60] sm:$0xff]   ;;  %v521_v20 = vld [vmem:[%s681_s1 + $0x68] sm:$0xff]  }
   0x6   :  { %481 = vmatprep.subr.bf16.mxu1 %v506_v5  ;;  %v514_v13 = vld [vmem:[%s681_s1 + $0xd8] sm:$0xff]   ;;  %v518_v17 = vld [vmem:[%s681_s1 + $0xe0] sm:$0xff]   ;;  %v522_v21 = vld [vmem:[%s681_s1 + $0xe8] sm:$0xff]  }
   0x7   :  { %v515_v14 = vld [vmem:[%s681_s1 + $0x18] sm:$0xff]   ;;  %v519_v18 = vld [vmem:[%s681_s1 + $0x20] sm:$0xff]   ;;  %v523_v22 = vld [vmem:[%s681_s1 + $0x28] sm:$0xff]  }
   0x8   :  { %460 = vmatpush3.bf16.msra.mxu0 %v507_v6  ;;  %v516_v15 = vld [vmem:[%s681_s1 + $0x98] sm:$0xff]   ;;  %v520_v19 = vld [vmem:[%s681_s1 + $0xa0] sm:$0xff]   ;;  %v524_v23 = vld [vmem:[%s681_s1 + $0xa8] sm:$0xff]  }
   0x9   :  { %482 = vmatpush3.bf16.msra.mxu1 %v508_v7  ;;  %461 = vmatprep.subr.bf16.mxu0 %v509_v8  ;;  %v525_v24 = vld [vmem:[%s681_s1 + $0x70] sm:$0xff]   ;;  %v529_v28 = vld [vmem:[%s681_s1 + $0x78] sm:$0xff]   ;;  %v407_v38 = vld [vmem:[%s683_s2] ss:$0 sm:$0xff] }
   0xa   :  { %483 = vmatprep.subr.bf16.mxu1 %v510_v9  ;;  %v526_v25 = vld [vmem:[%s681_s1 + $0xf0] sm:$0xff]   ;;  %v530_v29 = vld [vmem:[%s681_s1 + $0xf8] sm:$0xff]   ;;  %v449_v44 = vld [vmem:[%s684_s3] sm:$0xff]  }
   0xb   :  { %v527_v26 = vld [vmem:[%s681_s1 + $0x30] sm:$0xff]   ;;  %v531_v30 = vld [vmem:[%s681_s1 + $0x38] sm:$0xff]   ;;  %v450_v52 = vunpack.c.l.bf16 %v449_v44  ;;  %v451_v54 = vunpack.c.h.bf16 %v449_v44 }
   0xc   :  { %462 = vmatpush3.bf16.msra.mxu0 %v511_v10  ;;  %v528_v27 = vld [vmem:[%s681_s1 + $0xb0] sm:$0xff]   ;;  %v532_v31 = vld [vmem:[%s681_s1 + $0xb8] sm:$0xff]  }
   0xd   :  { %484 = vmatpush3.bf16.msra.mxu1 %v512_v11  ;;  %463 = vmatprep.subr.bf16.mxu0 %v513_v12  ;;  %v533_v32 = vld [vmem:[%s682_s0] ss:$16 sps:$4 sm:$0xff]   ;;  %v535_v33 = vld [vmem:[%s682_s0 + $0x4] ss:$16 sps:$4 sm:$0xff]   ;;  %v536_v34 = vld [vmem:[%s682_s0 + $0x8] ss:$16 sps:$4 sm:$0xff]  }
   0xe   :  { %485 = vmatprep.subr.bf16.mxu1 %v514_v13  ;;  %v538_v35 = vld [vmem:[%s682_s0 + $0xc] ss:$16 sps:$4 sm:$0xff]   ;;  %337 = vmatprep.mubr.bf16.mxu0 %v535_v33 }
   0xf   :  { %378 = vmatprep.mubr.bf16.mxu1 %v538_v35 }
  0x10   :  { %464 = vmatpush3.bf16.msra.mxu0 %v515_v14 }
  0x11   :  { %486 = vmatpush3.bf16.msra.mxu1 %v516_v15  ;;  %465 = vmatprep.subr.bf16.mxu0 %v517_v16 }
  0x12   :  { %487 = vmatprep.subr.bf16.mxu1 %v518_v17 }
  0x14   :  { %466 = vmatpush3.bf16.msra.mxu0 %v519_v18 }
  0x15   :  { %488 = vmatpush3.bf16.msra.mxu1 %v520_v19  ;;  %467 = vmatprep.subr.bf16.mxu0 %v521_v20 }
  0x16   :  { %489 = vmatprep.subr.bf16.mxu1 %v522_v21 }
  0x18   :  { %468 = vmatpush3.bf16.msra.mxu0 %v523_v22 }
  0x19   :  { %490 = vmatpush3.bf16.msra.mxu1 %v524_v23  ;;  %469 = vmatprep.subr.bf16.mxu0 %v525_v24 }
  0x1a   :  { %491 = vmatprep.subr.bf16.mxu1 %v526_v25 }
  0x1c   :  { %470 = vmatpush3.bf16.msra.mxu0 %v527_v26 }
  0x1d   :  { %492 = vmatpush3.bf16.msra.mxu1 %v528_v27  ;;  %471 = vmatprep.subr.bf16.mxu0 %v529_v28 }
  0x1e   :  { %493 = vmatprep.subr.bf16.mxu1 %v530_v29 }
  0x20   :  { %472 = vmatpush3.bf16.msra.mxu0 %v531_v30 }
  0x21   :  { %494 = vmatpush3.bf16.msra.mxu1 %v532_v31 }
  0x23   :  { %338 = vmatmul.mubr.bf16.vlgmr.msra.gmra.mrb[0].mxu0 %v533_v32 }
  0x24   :  { %379 = vmatmul.mubr.bf16.vlgmr.msra.gmra.mrb[0].mxu1 %v536_v34 }
  0xf6   :  { %v473_v36 = vpop.f32.mrb[0].mxu0 }
  0xf7   :  { %v495_v37 = vpop.f32.mrb[0].mxu1  ;;  %v474_v39 = vpop.f32.mrb[1].mxu0 }
  0xf8   :  { %v475_v40 = vadd.f32 %v474_v39, %v473_v36  ;;  %v496_v41 = vpop.f32.mrb[1].mxu1  ;;  %v476_v42 = vpop.f32.mrb[2].mxu0 }
  0xf9   :  { %v497_v43 = vadd.f32 %v496_v41, %v495_v37  ;;  %v498_v45 = vpop.f32.mrb[2].mxu1  ;;  %v477_v46 = vpop.f32.mrb[3].mxu0 }
  0xfa   :  { %v340_v47 = vadd.f32 %v475_v40, %v407_v38  ;;  %v478_v48 = vadd.f32 %v477_v46, %v476_v42  ;;  %v499_v49 = vpop.f32.mrb[3].mxu1 }
  0xfb   :  { %v500_v50 = vadd.f32 %v499_v49, %v498_v45 }
  0xfc   :  { %v381_v51 = vadd.f32 %v497_v43, %v340_v47  ;;  %v343_v53 = vadd.f32 %v478_v48, %v407_v38 }
  0xfe   :  { %v384_v55 = vadd.f32 %v500_v50, %v343_v53  ;;  %v391_v56 = vadd.f32 %v450_v52, %v381_v51 }
 0x100   :  { %v392_v57 = vadd.f32 %v451_v54, %v384_v55 }
 0x102   :  { %v455_v58 = vpack.c.bf16 %v392_v57, %v391_v56 }
 0x104   :  { %456 = vst [vmem:[%s685_s4] sm:$0xff] %v455_v58  }

// kernel: cagm_forward.21
= control target key start
LH: loop header
LB: loop body
LE: loop exit
PB: predicated region body
PF: predicated region fallthrough
CT: control target
= control target key end

     0   :  { %s1373_s21 = smov 0   ;;  %s1375_s22 = smov 0   ;;  %s1697_s0 = inlined_call_operand.vmem [shape: bf16[16,128], index: 0, kind: input, shape index: {}]   ;;  %s1698_s1 = inlined_call_operand.vmem [shape: bf16[128,1024], index: 1, kind: input, shape index: {}]   ;;  %s1699_s2 = inlined_call_operand.vmem [shape: f32[1,128], index: 2, kind: input, shape index: {}]   ;;  %s1700_s3 = inlined_call_operand.vmem [shape: f32[1,128], index: 3, kind: input, shape index: {}]   ;;  %s1701_s4 = inlined_call_operand.vmem [shape: s32[16,1], index: 4, kind: input, shape index: {}]   ;;  %s1702_s5 = inlined_call_operand.vmem [shape: bf16[16,1024], index: 5, kind: output, shape index: {0}]   ;;  %s1703_s6 = inlined_call_operand.vmem [shape: f32[16,1], index: 6, kind: output, shape index: {1}]  }
   0x1   :  { %s1377_s23 = smov 0   ;;  %s1379_s24 = smov 0  }
   0x2   :  { %s1381_s25 = smov 0  }
   0x3 LB: > { %s26_s26 = sadd.s32 1, %s1328_s24  ;;  %s1100_s27 = sadd.s32 4294967295, %s1332_s25   ;;  %s1332_s25 = sphi %s1381_s25, %s17_s25   ;;  %s1328_s24 = sphi %s1379_s24, %s1708_s24   ;;  %s1324_s23 = sphi %s1377_s23, %s1707_s23   ;;  %s1320_s22 = sphi %s1375_s22, %s1706_s22   ;;  %s1316_s21 = sphi %s1373_s21, %s1705_s21  }
   0x4   : > { %p27_p0 = scmp.ge.s32.totalorder %s26_s26, 2  ;;  %p69_p1 = scmp.ne.s32.totalorder %s1320_s22, %s1316_s21 }
   0x5   : > { %p70_p2 = scmp.eq.s32.totalorder %s1332_s25, 0  ;;  %p169_p4 = scmp.eq.s32.totalorder %s1100_s27, 1 }
   0x6   : > { %s1710_s26 = smov (%p27_p0, %s26_s26), 0  ;;  %s62_s29 = sadd.s32 1, %s1320_s22 }
   0x7   : > { %p71_p3 = por %p70_p2, %p69_p1  ;;  %s59_s28 = ssub.s32 %s1328_s24, %s1710_s26 }
   0x8   : > { %p60_p5 = scmp.eq.s32.totalorder %s59_s28, 0  ;;  %p1408_p6 = por %p169_p4, %p69_p1 }
   0x9   : > { %p1105_p7 = scmp.ge.s32.totalorder %s1332_s25, 2 }
   0xa   : > { %s1413_s7 = scalar_select %p60_p5, %s1320_s22, %s62_s29  }
   0xb   : > { %241 = sbr.rel (%p1105_p7) target bundleno = 38 (0x26), region = 32 }
  0x12   : > { %244 = sbr.rel (!%p71_p3) target bundleno = 38 (0x26), region = 36  ;;  %s246_s8 = sand.u32 (%p71_p3), 1, %s1320_s22  }
  0x13   : > { %s1162_s9 = sshll.u32 (%p71_p3), %s1328_s24, 4  ;;  %s1106_s10 = sshll.u32 (%p71_p3), %s246_s8, 8 }
  0x14   : > { %s1421_s13 = scalar_lea.vmem (%p71_p3), %s1698_s1, %s1162_s9  ;;  %s1426_s14 = scalar_lea.vmem (%p71_p3), [#allocation6], %s1106_s10 }
  0x15   : > { %v264_v0 = vld [vmem:[%s1421_s13] sm:$0xff] (%p71_p3)  ;;  %v266_v1 = vld [vmem:[%s1421_s13 + $0x8] sm:$0xff] (%p71_p3) }
  0x16   : > { %v268_v2 = vld [vmem:[%s1421_s13 + $0x20] sm:$0xff] (%p71_p3)  ;;  %265 = vst [vmem:[%s1426_s14] sm:$0xff] (%p71_p3), %v264_v0  ;;  %267 = vst [vmem:[%s1426_s14 + $0x8] sm:$0xff] (%p71_p3), %v266_v1  ;;  %v270_v3 = vld [vmem:[%s1421_s13 + $0x28] sm:$0xff] (%p71_p3) }
  0x17   : > { %269 = vst [vmem:[%s1426_s14 + $0x10] sm:$0xff] (%p71_p3), %v268_v2  ;;  %v272_v4 = vld [vmem:[%s1421_s13 + $0x40] sm:$0xff] (%p71_p3)  ;;  %v274_v5 = vld [vmem:[%s1421_s13 + $0x48] sm:$0xff] (%p71_p3)  ;;  %271 = vst [vmem:[%s1426_s14 + $0x18] sm:$0xff] (%p71_p3), %v270_v3 }
  0x18   : > { %273 = vst [vmem:[%s1426_s14 + $0x20] sm:$0xff] (%p71_p3), %v272_v4  ;;  %275 = vst [vmem:[%s1426_s14 + $0x28] sm:$0xff] (%p71_p3), %v274_v5  ;;  %v276_v6 = vld [vmem:[%s1421_s13 + $0x60] sm:$0xff] (%p71_p3)  ;;  %v278_v7 = vld [vmem:[%s1421_s13 + $0x68] sm:$0xff] (%p71_p3) }
  0x19   : > { %v280_v8 = vld [vmem:[%s1421_s13 + $0x80] sm:$0xff]  ;;  %277 = vst [vmem:[%s1426_s14 + $0x30] sm:$0xff] %v276_v6  ;;  %279 = vst [vmem:[%s1426_s14 + $0x38] sm:$0xff] %v278_v7  ;;  %v282_v9 = vld [vmem:[%s1421_s13 + $0x88] sm:$0xff] }
  0x1a   : > { %281 = vst [vmem:[%s1426_s14 + $0x40] sm:$0xff] %v280_v8  ;;  %v284_v10 = vld [vmem:[%s1421_s13 + $0xa0] sm:$0xff]  ;;  %v286_v11 = vld [vmem:[%s1421_s13 + $0xa8] sm:$0xff]  ;;  %283 = vst [vmem:[%s1426_s14 + $0x48] sm:$0xff] %v282_v9 }
  0x1b   : > { %285 = vst [vmem:[%s1426_s14 + $0x50] sm:$0xff] %v284_v10  ;;  %287 = vst [vmem:[%s1426_s14 + $0x58] sm:$0xff] %v286_v11  ;;  %v288_v12 = vld [vmem:[%s1421_s13 + $0xc0] sm:$0xff]  ;;  %v290_v13 = vld [vmem:[%s1421_s13 + $0xc8] sm:$0xff] }
  0x1c   : > { %v292_v14 = vld [vmem:[%s1421_s13 + $0xe0] sm:$0xff]  ;;  %289 = vst [vmem:[%s1426_s14 + $0x60] sm:$0xff] %v288_v12  ;;  %291 = vst [vmem:[%s1426_s14 + $0x68] sm:$0xff] %v290_v13  ;;  %v294_v15 = vld [vmem:[%s1421_s13 + $0xe8] sm:$0xff] }
  0x1d   : > { %293 = vst [vmem:[%s1426_s14 + $0x70] sm:$0xff] %v292_v14  ;;  %v296_v16 = vld [vmem:[%s1421_s13 + $0x100] sm:$0xff]  ;;  %v298_v17 = vld [vmem:[%s1421_s13 + $0x108] sm:$0xff]  ;;  %295 = vst [vmem:[%s1426_s14 + $0x78] sm:$0xff] %v294_v15 }
  0x1e   : > { %297 = vst [vmem:[%s1426_s14 + $0x80] sm:$0xff] %v296_v16  ;;  %299 = vst [vmem:[%s1426_s14 + $0x88] sm:$0xff] %v298_v17  ;;  %v300_v18 = vld [vmem:[%s1421_s13 + $0x120] sm:$0xff]  ;;  %v302_v19 = vld [vmem:[%s1421_s13 + $0x128] sm:$0xff] }
  0x1f   : > { %v304_v20 = vld [vmem:[%s1421_s13 + $0x140] sm:$0xff]  ;;  %301 = vst [vmem:[%s1426_s14 + $0x90] sm:$0xff] %v300_v18  ;;  %303 = vst [vmem:[%s1426_s14 + $0x98] sm:$0xff] %v302_v19  ;;  %v306_v21 = vld [vmem:[%s1421_s13 + $0x148] sm:$0xff] }
  0x20   : > { %305 = vst [vmem:[%s1426_s14 + $0xa0] sm:$0xff] %v304_v20  ;;  %v308_v22 = vld [vmem:[%s1421_s13 + $0x160] sm:$0xff]  ;;  %v310_v23 = vld [vmem:[%s1421_s13 + $0x168] sm:$0xff]  ;;  %307 = vst [vmem:[%s1426_s14 + $0xa8] sm:$0xff] %v306_v21 }
  0x21   : > { %309 = vst [vmem:[%s1426_s14 + $0xb0] sm:$0xff] %v308_v22  ;;  %311 = vst [vmem:[%s1426_s14 + $0xb8] sm:$0xff] %v310_v23  ;;  %v312_v24 = vld [vmem:[%s1421_s13 + $0x180] sm:$0xff]  ;;  %v314_v25 = vld [vmem:[%s1421_s13 + $0x188] sm:$0xff] }
  0x22   : > { %v316_v26 = vld [vmem:[%s1421_s13 + $0x1a0] sm:$0xff]  ;;  %313 = vst [vmem:[%s1426_s14 + $0xc0] sm:$0xff] %v312_v24  ;;  %315 = vst [vmem:[%s1426_s14 + $0xc8] sm:$0xff] %v314_v25  ;;  %v318_v27 = vld [vmem:[%s1421_s13 + $0x1a8] sm:$0xff] }
  0x23   : > { %317 = vst [vmem:[%s1426_s14 + $0xd0] sm:$0xff] %v316_v26  ;;  %v320_v28 = vld [vmem:[%s1421_s13 + $0x1c0] sm:$0xff]  ;;  %v322_v29 = vld [vmem:[%s1421_s13 + $0x1c8] sm:$0xff]  ;;  %319 = vst [vmem:[%s1426_s14 + $0xd8] sm:$0xff] %v318_v27 }
  0x24   : > { %321 = vst [vmem:[%s1426_s14 + $0xe0] sm:$0xff] %v320_v28  ;;  %323 = vst [vmem:[%s1426_s14 + $0xe8] sm:$0xff] %v322_v29  ;;  %v324_v30 = vld [vmem:[%s1421_s13 + $0x1e0] sm:$0xff]  ;;  %v326_v31 = vld [vmem:[%s1421_s13 + $0x1e8] sm:$0xff] }
  0x25   : > { %325 = vst [vmem:[%s1426_s14 + $0xf0] sm:$0xff] %v324_v30  ;;  %327 = vst [vmem:[%s1426_s14 + $0xf8] sm:$0xff] %v326_v31 }
  0x26 PF: > { %p1109_p8 = scmp.ge.s32.totalorder %s1332_s25, 1  ;;  %p332_p9 = scmp.lt.s32.totalorder %s1332_s25, 3 }
  0x28   : > { %p333_p10 = pnand %p1109_p8, %p332_p9 }
  0x29   : > { %s339_s15 = sand.u32 (!%p333_p10), 1, %s1316_s21   ;;  %p1112_p11 = scmp.ne.s32.totalorder (!%p333_p10), %s1324_s23, 0 }
  0x2a   : > { %336 = sbr.rel (%p333_p10) target bundleno = 1100 (0x44c), region = 59  ;;  %s1110_s16 = sshll.u32 (!%p333_p10), %s339_s15, 8 }
  0x2b   : > { %s1111_s17 = sshll.u32 (!%p333_p10), %s339_s15, 5  ;;  %s1492_s18 = scalar_lea.vmem (!%p333_p10), [#allocation6], %s1110_s16 }
  0x2c   : > { %s1494_s19 = scalar_lea.vmem (!%p333_p10), [#allocation7], %s1111_s17 }
  0x31   : > { %407 = sbr.rel (%p1112_p11) target bundleno = 370 (0x172), region = 67  ;;  %v1169_v32 = vld [vmem:[%s1697_s0] sm:$0xff] (!%p1112_p11)   ;;  %vm455_vm0 = vcmask (!%p1112_p11), 7168   ;;  %v1334_v43 = vmov (!%p1112_p11), -inf   ;;  %v1335_v44 = vmov (!%p1112_p11), 0.0  }
  0x32   : > { %v1170_v33 = vunpack.c.l.bf16 (!%p1112_p11), %v1169_v32  ;;  %v1171_v34 = vunpack.c.h.bf16 (!%p1112_p11), %v1169_v32  ;;  %456 = vst.msk [vmem:[#allocation3] sm:$0xff] (!%p1112_p11), %vm455_vm0, %v1334_v43  ;;  %457 = vst.msk [vmem:[#allocation3 + $0x8] sm:$0xff] (!%p1112_p11), %vm455_vm0, %v1334_v43  ;;  %v1113_v53 = vld [vmem:[%s1699_s2] ss:$0 sm:$0xff] (!%p1112_p11) }
  0x33   : > { %458 = vst.msk [vmem:[#allocation4] sm:$0xff] (!%p1112_p11), %vm455_vm0, %v1335_v44  ;;  %459 = vst.msk [vmem:[#allocation4 + $0x8] sm:$0xff] (!%p1112_p11), %vm455_vm0, %v1335_v44  ;;  %v1114_v57 = vld [vmem:[%s1700_s3] ss:$0 sm:$0xff] (!%p1112_p11) }
  0x34   : > { %412 = vadd.xlane.f32.xlu0 (!%p1112_p11), %v1170_v33  ;;  %460 = vst.msk [vmem:[#allocation5] sm:$0xff] (!%p1112_p11), %vm455_vm0, %v1335_v44  ;;  %461 = vst.msk [vmem:[#allocation5 + $0x8] sm:$0xff] (!%p1112_p11), %vm455_vm0, %v1335_v44 }
  0x38   : > { %414 = vadd.xlane.f32.xlu0 %v1171_v34 }
  0xc1   : > { %v413_v35 = vpop.xlane.xlu0 %412 }
  0xc2   : > { %v417_v36 = vmul.f32 0.0078125, %v413_v35 }
  0xc4   : > { %v419_v37 = vsub.f32 %v1170_v33, %v417_v36 }
  0xc5   : > { %v415_v38 = vpop.xlane.xlu0 %414 }
  0xc6   : > { %v418_v39 = vmul.f32 0.0078125, %v415_v38  ;;  %v421_v40 = vmul.f32 %v419_v37, %v419_v37 }
  0xc8   : > { %v420_v41 = vsub.f32 %v1171_v34, %v418_v39  ;;  %423 = vadd.xlane.f32.xlu1 %v421_v40 }
  0xca   : > { %v422_v42 = vmul.f32 %v420_v41, %v420_v41 }
  0xcc   : > { %425 = vadd.xlane.f32.xlu1 %v422_v42 }
 0x155   : > { %v424_v45 = vpop.xlane.xlu1 %423 }
 0x156   : > { %v427_v46 = vmul.f32 0.0078125, %v424_v45 }
 0x158   : > { %v429_v47 = vadd.f32 1e-05, %v427_v46 }
 0x159   : > { %v426_v48 = vpop.xlane.xlu1 %425 }
 0x15a   : > { %1216 = vrsqrt.f32 %v429_v47  ;;  %v428_v49 = vmul.f32 0.0078125, %v426_v48 }
 0x15c   : > { %v430_v50 = vadd.f32 1e-05, %v428_v49 }
 0x15e   : > { %1218 = vrsqrt.f32 %v430_v50 }
 0x164   : > { %v1217_v51 = vpop.eup %1216 }
 0x165   : > { %v433_v52 = vmul.f32 %v1217_v51, %v419_v37 }
 0x167   : > { %v442_v55 = vmul.f32 %v1113_v53, %v433_v52 }
 0x168   : > { %v1219_v54 = vpop.eup %1218 }
 0x169   : > { %v434_v56 = vmul.f32 %v1219_v54, %v420_v41  ;;  %v451_v59 = vadd.f32 %v1114_v57, %v442_v55 }
 0x16b   : > { %v443_v58 = vmul.f32 %v1113_v53, %v434_v56 }
 0x16d   : > { %v452_v60 = vadd.f32 %v1114_v57, %v443_v58 }
 0x16f   : > { %v453_v61 = vpack.c.bf16 %v452_v60, %v451_v59 }
 0x171   : > { %454 = vst [vmem:[#allocation2] sm:$0xff] %v453_v61 }
 0x172 PF: > { %v1222_v62 = vld [vmem:[%s1492_s18 + $0x4] ss:$16 sps:$4 sm:$0xff]   ;;  %v1224_v63 = vld [vmem:[%s1492_s18 + $0xc] ss:$16 sps:$4 sm:$0xff]   ;;  %v1336_v0 = vmov 0   ;;  %v771_v32 = vlaneseq  ;;  %s1151_s9 = sshll.u32 %s1324_s23, 9 }
 0x173   : > { %687 = vmatprep.mubr.bf16.mxu0 %v1336_v0  ;;  %730 = vmatprep.mubr.bf16.mxu1 %v1336_v0  ;;  %v1226_v1 = vld [vmem:[%s1492_s18] ss:$16 sps:$4 sm:$0xff]   ;;  %v1227_v2 = vld [vmem:[%s1492_s18 + $0x8] ss:$16 sps:$4 sm:$0xff]   ;;  %v1228_v3 = vld [vmem:[%s1492_s18 + $0x24] ss:$16 sps:$4 sm:$0xff]   ;;  %v777_v35 = vstv %s1151_s9 }
 0x174   : > { %655 = vmatprep.subr.bf16.mxu0 %v1222_v62  ;;  %1221 = vset.pattern.permute.xlu0 %v1336_v0  ;;  %v1230_v4 = vld [vmem:[%s1492_s18 + $0x2c] ss:$16 sps:$4 sm:$0xff]   ;;  %v1232_v5 = vld [vmem:[%s1492_s18 + $0x20] ss:$16 sps:$4 sm:$0xff]   ;;  %v1233_v6 = vld [vmem:[%s1492_s18 + $0x28] ss:$16 sps:$4 sm:$0xff]  }
 0x175   : > { %698 = vmatprep.subr.bf16.mxu1 %v1224_v63  ;;  %1220 = vset.pattern.permute.xlu1 %v1336_v0  ;;  %v1234_v7 = vld [vmem:[%s1492_s18 + $0x44] ss:$16 sps:$4 sm:$0xff]   ;;  %v1236_v8 = vld [vmem:[%s1492_s18 + $0x4c] ss:$16 sps:$4 sm:$0xff]   ;;  %v1238_v9 = vld [vmem:[%s1492_s18 + $0x40] ss:$16 sps:$4 sm:$0xff]  }
 0x176   : > { %656 = vmatpush1.bf16.msra.mxu0 %v1226_v1  ;;  %699 = vmatpush1.bf16.msra.mxu1 %v1227_v2  ;;  %v1239_v10 = vld [vmem:[%s1492_s18 + $0x48] ss:$16 sps:$4 sm:$0xff]   ;;  %v1240_v11 = vld [vmem:[%s1492_s18 + $0x64] ss:$16 sps:$4 sm:$0xff]   ;;  %v1242_v12 = vld [vmem:[%s1492_s18 + $0x6c] ss:$16 sps:$4 sm:$0xff]  }
 0x177   : > { %657 = vmatprep.subr.bf16.mxu0 %v1228_v3  ;;  %700 = vmatprep.subr.bf16.mxu1 %v1230_v4  ;;  %v1244_v13 = vld [vmem:[%s1492_s18 + $0x60] ss:$16 sps:$4 sm:$0xff]   ;;  %v1245_v14 = vld [vmem:[%s1492_s18 + $0x68] ss:$16 sps:$4 sm:$0xff]   ;;  %v1246_v15 = vld [vmem:[%s1492_s18 + $0x84] ss:$16 sps:$4 sm:$0xff]  }
 0x178   : > { %v1248_v16 = vld [vmem:[%s1492_s18 + $0x8c] ss:$16 sps:$4 sm:$0xff]   ;;  %v1250_v17 = vld [vmem:[%s1492_s18 + $0x80] ss:$16 sps:$4 sm:$0xff]   ;;  %v1251_v18 = vld [vmem:[%s1492_s18 + $0x88] ss:$16 sps:$4 sm:$0xff]  }
 0x179   : > { %v1252_v19 = vld [vmem:[%s1492_s18 + $0xa4] ss:$16 sps:$4 sm:$0xff]   ;;  %v1254_v20 = vld [vmem:[%s1492_s18 + $0xac] ss:$16 sps:$4 sm:$0xff]   ;;  %v1256_v21 = vld [vmem:[%s1492_s18 + $0xa0] ss:$16 sps:$4 sm:$0xff]  }
 0x17a   : > { %658 = vmatpush1.bf16.msra.mxu0 %v1232_v5  ;;  %701 = vmatpush1.bf16.msra.mxu1 %v1233_v6  ;;  %v1257_v22 = vld [vmem:[%s1492_s18 + $0xa8] ss:$16 sps:$4 sm:$0xff]   ;;  %v1258_v23 = vld [vmem:[%s1492_s18 + $0xc4] ss:$16 sps:$4 sm:$0xff]   ;;  %v1260_v24 = vld [vmem:[%s1492_s18 + $0xcc] ss:$16 sps:$4 sm:$0xff]  }
 0x17b   : > { %659 = vmatprep.subr.bf16.mxu0 %v1234_v7  ;;  %702 = vmatprep.subr.bf16.mxu1 %v1236_v8  ;;  %v1262_v25 = vld [vmem:[%s1492_s18 + $0xc0] ss:$16 sps:$4 sm:$0xff]   ;;  %v1263_v26 = vld [vmem:[%s1492_s18 + $0xc8] ss:$16 sps:$4 sm:$0xff]   ;;  %v1264_v27 = vld [vmem:[%s1492_s18 + $0xe4] ss:$16 sps:$4 sm:$0xff]  }
 0x17c   : > { %v1266_v28 = vld [vmem:[%s1492_s18 + $0xec] ss:$16 sps:$4 sm:$0xff]   ;;  %v1268_v29 = vld [vmem:[%s1492_s18 + $0xe0] ss:$16 sps:$4 sm:$0xff]   ;;  %v1269_v30 = vld [vmem:[%s1492_s18 + $0xe8] ss:$16 sps:$4 sm:$0xff]  }
 0x17d   : > { %v462_v31 = vld [vmem:[#allocation2] sm:$0xff]  ;;  %v772_v33 = vand.u32 127, %v771_v32  ;;  %v1608_v5 = vld [vmem:[#allocation3] sm:$0xff]  ;;  %vm864_vm5 = vcmask 7168   ;;  %v1613_v8 = vld [vmem:[#allocation3 + $0x8] sm:$0xff]  ;;  %p1152_p12 = scmp.ne.s32.totalorder %s1324_s23, 1 }
 0x17e   : > { %660 = vmatpush1.bf16.msra.mxu0 %v1238_v9  ;;  %703 = vmatpush1.bf16.msra.mxu1 %v1239_v10  ;;  %v1605_v4 = vld [vmem:[%s1701_s4] sm:$0xff] }
 0x17f   : > { %661 = vmatprep.subr.bf16.mxu0 %v1240_v11  ;;  %704 = vmatprep.subr.bf16.mxu1 %v1242_v12  ;;  %v774_v34 = vadd.s32 256, %v772_v33  ;;  %v773_v36 = vadd.s32 128, %v772_v33  ;;  %v775_v37 = vadd.s32 384, %v772_v33  ;;  %v1539_v38 = vadd.s32 %v777_v35, %v772_v33 }
 0x180   : > { %vm911_vm14 = vcmp.ne.s32.totalorder (!%p1152_p12), %v1605_v4, 4294967196 }
 0x181   : > { %v1541_v39 = vadd.s32 %v777_v35, %v774_v34  ;;  %v1543_v40 = vadd.s32 %v777_v35, %v773_v36  ;;  %v1545_v41 = vadd.s32 %v777_v35, %v775_v37  ;;  %vm782_vm1 = vcmp.lt.s32.totalorder %v1539_v38, 640 }
 0x182   : > { %662 = vmatpush1.bf16.msra.mxu0 %v1244_v13  ;;  %705 = vmatpush1.bf16.msra.mxu1 %v1245_v14  ;;  %v1631_v13 = vld [vmem:[%s1701_s4 + $0x8] sm:$0xff] }
 0x183   : > { %663 = vmatprep.subr.bf16.mxu0 %v1246_v15  ;;  %706 = vmatprep.subr.bf16.mxu1 %v1248_v16  ;;  %vm784_vm2 = vcmp.lt.s32.totalorder %v1541_v39, 640  ;;  %vm783_vm3 = vcmp.lt.s32.totalorder %v1543_v40, 640  ;;  %vm785_vm4 = vcmp.lt.s32.totalorder %v1545_v41, 640  ;;  %vm912_vm15 = vcmp.ne.s32.totalorder (!%p1152_p12), %v1631_v13, 4294967196 }
 0x186   : > { %664 = vmatpush1.bf16.msra.mxu0 %v1250_v17  ;;  %707 = vmatpush1.bf16.msra.mxu1 %v1251_v18 }
 0x187   : > { %665 = vmatprep.subr.bf16.mxu0 %v1252_v19  ;;  %708 = vmatprep.subr.bf16.mxu1 %v1254_v20 }
 0x18a   : > { %666 = vmatpush1.bf16.msra.mxu0 %v1256_v21  ;;  %709 = vmatpush1.bf16.msra.mxu1 %v1257_v22 }
 0x18b   : > { %667 = vmatprep.subr.bf16.mxu0 %v1258_v23  ;;  %710 = vmatprep.subr.bf16.mxu1 %v1260_v24 }
 0x18e   : > { %668 = vmatpush1.bf16.msra.mxu0 %v1262_v25  ;;  %711 = vmatpush1.bf16.msra.mxu1 %v1263_v26 }
 0x18f   : > { %669 = vmatprep.subr.bf16.mxu0 %v1264_v27  ;;  %712 = vmatprep.subr.bf16.mxu1 %v1266_v28 }
 0x192   : > { %670 = vmatpush1.bf16.msra.mxu0 %v1268_v29  ;;  %713 = vmatpush1.bf16.msra.mxu1 %v1269_v30 }
 0x195   : > { %688 = vmatmul.mubr.bf16.vlgmr.msra.gmra.mrb[0].mxu0 %v462_v31  ;;  %731 = vmatmul.mubr.bf16.vlgmr.msra.gmra.mrb[0].mxu1 %v462_v31 }
 0x268   : > { %v689_v42 = vpop.f32.mrb[0].mxu0  ;;  %v732_v43 = vpop.f32.mrb[0].mxu1 }
 0x269   : > { %v691_v44 = vpop.f32.mrb[1].mxu0  ;;  %v734_v45 = vpop.f32.mrb[1].mxu1  ;;  %v1553_v46 = vsel %vm782_vm1, %v689_v42, -inf  ;;  %v1557_v47 = vsel %vm784_vm2, %v732_v43, -inf }
 0x26a   : > { %v1163_v48 = vpack.c.bf16 %v691_v44, %v689_v42  ;;  %v1164_v49 = vpack.c.bf16 %v734_v45, %v732_v43  ;;  %v1559_v50 = vpop.f32.mrb[2].mxu0  ;;  %v1561_v51 = vpop.f32.mrb[2].mxu1  ;;  %v787_v52 = vsel %vm783_vm3, %v691_v44, -inf  ;;  %v789_v53 = vsel %vm785_vm4, %v734_v45, -inf }
 0x26b   : > { %v1570_v54 = vsel %vm782_vm1, %v1559_v50, -inf  ;;  %v1575_v55 = vsel %vm784_vm2, %v1561_v51, -inf  ;;  %v1577_v56 = vpop.f32.mrb[3].mxu0  ;;  %v1579_v57 = vpop.f32.mrb[3].mxu1  ;;  %v796_v58 = vmax.f32 %v1553_v46, %v1557_v47  ;;  %v797_v59 = vmax.f32 %v787_v52, %v789_v53 }
 0x26c   : > { %765 = vst [vmem:[%s1494_s19] sm:$0xff] %v1163_v48  ;;  %766 = vst [vmem:[%s1494_s19 + $0x8] sm:$0xff] %v1164_v49  ;;  %v1165_v60 = vpack.c.bf16 %v1577_v56, %v1559_v50  ;;  %v791_v61 = vsel %vm783_vm3, %v1577_v56, -inf  ;;  %v1166_v62 = vpack.c.bf16 %v1579_v57, %v1561_v51  ;;  %v1595_v63 = vsel %vm785_vm4, %v1579_v57, -inf }
 0x26d   : > { %v802_v0 = vmax.f32 %v791_v61, %v1595_v63  ;;  %v798_v1 = vmax.f32 %v796_v58, %v797_v59  ;;  %v801_v2 = vmax.f32 %v1570_v54, %v1575_v55 }
 0x26e   : > { %767 = vst [vmem:[%s1494_s19 + $0x10] sm:$0xff] %v1165_v60  ;;  %768 = vst [vmem:[%s1494_s19 + $0x18] sm:$0xff] %v1166_v62 }
 0x26f   : > { %799 = vmax.xlane.f32.xlu0 %v798_v1  ;;  %v803_v3 = vmax.f32 %v801_v2, %v802_v0 }
 0x273   : > { %804 = vmax.xlane.f32.xlu0 %v803_v3 }
 0x289   : > { %870 = vperm.xlu0 %1221, %v1605_v4  }
 0x2fc   : > { %v800_v6 = vpop.xlane.xlu0 %799 }
 0x2fd   : > { %v1611_v7 = vmax.f32 %v1608_v5, %v800_v6  ;;  %v808_v6 = vld [vmem:[#allocation4] sm:$0xff] }
 0x2ff   : > { %v810_v9 = vsub.f32 %v1608_v5, %v1611_v7  ;;  %905 = vst.msk [vmem:[#allocation3] sm:$0xff] %vm864_vm5, %v1611_v7  ;;  %820 = vperm.xlu1 %1220, %v1611_v7   ;;  %v868_v5 = vld [vmem:[#allocation5 + $0x8] sm:$0xff] }
 0x300   : > { %v805_v10 = vpop.xlane.xlu0 %804 }
 0x301   : > { %v1621_v11 = vmax.f32 %v1613_v8, %v805_v10  ;;  %v812_v1 = vmul.f32 1.442695, %v810_v9 }
 0x303   : > { %v811_v12 = vsub.f32 %v1613_v8, %v1621_v11  ;;  %906 = vst.msk [vmem:[#allocation3 + $0x8] sm:$0xff] %vm864_vm5, %v1621_v11  ;;  %825 = vperm.xlu1 %1220, %v1621_v11  }
 0x305   : > { %v814_v2 = vmul.f32 1.442695, %v811_v12 }
 0x307   : > { %873 = vperm.xlu1 %1220, %v1631_v13  }
 0x308   : > { %v871_v14 = vpop.permute.xlu0 %870 }
 0x309   : > { %vm875_vm6 = vcmp.eq.s32.totalorder %v1539_v38, %v871_v14  ;;  %vm876_vm7 = vcmp.eq.s32.totalorder %v1543_v40, %v871_v14  ;;  %vm877_vm8 = vcmp.eq.s32.totalorder %v1541_v39, %v871_v14  ;;  %vm878_vm9 = vcmp.eq.s32.totalorder %v1545_v41, %v871_v14 }
 0x30a   : > { %v883_v15 = vsel %vm875_vm6, %v689_v42, 0.0  ;;  %v884_v16 = vsel %vm876_vm7, %v691_v44, 0.0  ;;  %v885_v18 = vsel %vm877_vm8, %v732_v43, 0.0  ;;  %v886_v20 = vsel %vm878_vm9, %v734_v45, 0.0 }
 0x30b   : > { %v891_v17 = vadd.f32 %v884_v16, %v883_v15  ;;  %v809_v16 = vld [vmem:[#allocation4 + $0x8] sm:$0xff] }
 0x30d   : > { %v892_v19 = vadd.f32 %v891_v17, %v885_v18 }
 0x30f   : > { %v893_v21 = vadd.f32 %v892_v19, %v886_v20 }
 0x311   : > { %894 = vadd.xlane.f32.xlu0 %v893_v21  ;;  %v917_v21 = vld [vmem:[#allocation3] sm:$0xff] (!%p1152_p12) }
 0x37e   : > { %v821_v22 = vpop.permute.xlu1 %820 }
 0x37f   : > { %v828_v23 = vsub.f32 %v1553_v46, %v821_v22  ;;  %v829_v24 = vsub.f32 %v787_v52, %v821_v22  ;;  %v830_v25 = vsub.f32 %v1557_v47, %v821_v22  ;;  %v831_v26 = vsub.f32 %v789_v53, %v821_v22 }
 0x381   : > { %v836_v27 = vmul.f32 1.442695, %v828_v23  ;;  %v838_v28 = vmul.f32 1.442695, %v829_v24  ;;  %v840_v29 = vmul.f32 1.442695, %v830_v25 }
 0x382   : > { %v842_v30 = vmul.f32 1.442695, %v831_v26  ;;  %v826_v31 = vpop.permute.xlu1 %825  ;;  %v918_v24 = vld [vmem:[#allocation3 + $0x8] sm:$0xff] (!%p1152_p12) }
 0x383   : > { %1270 = vpow2.f32 %v836_v27  ;;  %v832_v32 = vsub.f32 %v1570_v54, %v826_v31  ;;  %v833_v33 = vsub.f32 %v791_v61, %v826_v31  ;;  %v834_v34 = vsub.f32 %v1575_v55, %v826_v31 }
 0x384   : > { %1272 = vpow2.f32 %v838_v28  ;;  %v835_v35 = vsub.f32 %v1595_v63, %v826_v31  ;;  %v867_v63 = vld [vmem:[#allocation5] sm:$0xff] }
 0x385   : > { %1274 = vpow2.f32 %v840_v29  ;;  %v844_v36 = vmul.f32 1.442695, %v832_v32  ;;  %v846_v37 = vmul.f32 1.442695, %v833_v33  ;;  %v848_v42 = vmul.f32 1.442695, %v834_v34 }
 0x386   : > { %1276 = vpow2.f32 %v842_v30  ;;  %v874_v43 = vpop.permute.xlu1 %873  ;;  %v850_v44 = vmul.f32 1.442695, %v835_v35  ;;  %v1337_v29 = vmov (!%p1152_p12), 0.0  }
 0x387   : > { %1278 = vpow2.f32 %v844_v36  ;;  %vm879_vm10 = vcmp.eq.s32.totalorder %v1539_v38, %v874_v43  ;;  %vm880_vm11 = vcmp.eq.s32.totalorder %v1543_v40, %v874_v43  ;;  %vm881_vm12 = vcmp.eq.s32.totalorder %v1541_v39, %v874_v43 }
 0x388   : > { %1280 = vpow2.f32 %v846_v37  ;;  %v887_v45 = vsel %vm879_vm10, %v1559_v50, 0.0  ;;  %v888_v46 = vsel %vm880_vm11, %v1577_v56, 0.0  ;;  %vm882_vm13 = vcmp.eq.s32.totalorder %v1545_v41, %v874_v43 }
 0x389   : > { %v896_v47 = vadd.f32 %v888_v46, %v887_v45  ;;  %1282 = vpow2.f32 %v848_v42  ;;  %v889_v48 = vsel %vm881_vm12, %v1561_v51, 0.0  ;;  %v890_v38 = vsel %vm882_vm13, %v1579_v57, 0.0 }
 0x38a   : > { %1284 = vpow2.f32 %v850_v44  ;;  %v1153_v30 = vsel (!%p1152_p12), %vm911_vm14, 1.0, %v1337_v29  ;;  %v1154_v33 = vsel (!%p1152_p12), %vm912_vm15, 1.0, %v1337_v29 }
 0x38b   : > { %v897_v49 = vadd.f32 %v896_v47, %v889_v48  ;;  %1286 = vpow2.f32 %v812_v1 }
 0x38c   : > { %1288 = vpow2.f32 %v814_v2 }
 0x38d   : > { %v1271_v52 = vpop.eup %1270  ;;  %v898_v40 = vadd.f32 %v897_v49, %v890_v38 }
 0x38e   : > { %v1273_v53 = vpop.eup %1272 }
 0x38f   : > { %v1275_v39 = vpop.eup %1274  ;;  %v852_v54 = vadd.f32 %v1273_v53, %v1271_v52 }
 0x390   : > { %v1277_v55 = vpop.eup %1276 }
 0x391   : > { %v1279_v58 = vpop.eup %1278  ;;  %v853_v50 = vadd.f32 %v1275_v39, %v852_v54 }
 0x392   : > { %v1281_v59 = vpop.eup %1280 }
 0x393   : > { %v854_v56 = vadd.f32 %v1277_v55, %v853_v50  ;;  %v857_v60 = vadd.f32 %v1281_v59, %v1279_v58  ;;  %v1283_v41 = vpop.eup %1282 }
 0x394   : > { %v1285_v62 = vpop.eup %1284 }
 0x395   : > { %855 = vadd.xlane.f32.xlu1 %v854_v56  ;;  %v858_v61 = vadd.f32 %v1283_v41, %v857_v60  ;;  %v1287_v3 = vpop.eup %1286 }
 0x396   : > { %v816_v10 = vmul.f32 %v1287_v3, %v808_v6  ;;  %v1289_v14 = vpop.eup %1288 }
 0x397   : > { %v859_v51 = vadd.f32 %v1285_v62, %v858_v61  ;;  %v817_v18 = vmul.f32 %v1289_v14, %v809_v16 }
 0x399   : > { %860 = vadd.xlane.f32.xlu1 %v859_v51 }
 0x39d   : > { %899 = vadd.xlane.f32.xlu1 %v898_v40 }
 0x39e   : > { %v895_v57 = vpop.xlane.xlu0 %894 }
 0x39f   : > { %v901_v0 = vadd.f32 %v895_v57, %v867_v63 }
 0x3a1   : > { %903 = vst.msk [vmem:[#allocation5] sm:$0xff] %vm864_vm5, %v901_v0 }
 0x3a8   : > { %v927_v25 = vld [vmem:[#allocation5] sm:$0xff] (!%p1152_p12) }
 0x422   : > { %v856_v15 = vpop.xlane.xlu1 %855 }
 0x423   : > { %v862_v17 = vadd.f32 %v856_v15, %v816_v10 }
 0x425   : > { %865 = vst.msk [vmem:[#allocation4] sm:$0xff] %vm864_vm5, %v862_v17 }
 0x426   : > { %v861_v19 = vpop.xlane.xlu1 %860 }
 0x427   : > { %v863_v20 = vadd.f32 %v861_v19, %v817_v18  ;;  %910 = sbr.rel (%p1152_p12) target bundleno = 1093 (0x445), region = 71 }
 0x429   : > { %866 = vst.msk [vmem:[#allocation4 + $0x8] sm:$0xff] %vm864_vm5, %v863_v20 }
 0x42a   : > { %v900_v7 = vpop.xlane.xlu1 %899 }
 0x42b   : > { %v902_v9 = vadd.f32 %v900_v7, %v868_v5 }
 0x42c   : > { %v919_v8 = vld [vmem:[#allocation4] sm:$0xff] (!%p1152_p12) }
 0x42d   : > { %904 = vst.msk [vmem:[#allocation5 + $0x8] sm:$0xff] %vm864_vm5, %v902_v9  ;;  %1290 = vlog2.f32 (!%p1152_p12), %v919_v8 }
 0x430   : > { %v920_v11 = vld [vmem:[#allocation4 + $0x8] sm:$0xff] }
 0x431   : > { %1292 = vlog2.f32 %v920_v11 }
 0x434   : > { %v928_v28 = vld [vmem:[#allocation5 + $0x8] sm:$0xff] }
 0x437   : > { %v1291_v12 = vpop.eup %1290 }
 0x438   : > { %v922_v23 = vmul.f32 0.6931472, %v1291_v12 }
 0x43a   : > { %v925_v27 = vadd.f32 %v922_v23, %v917_v21 }
 0x43b   : > { %v1293_v22 = vpop.eup %1292 }
 0x43c   : > { %v924_v26 = vmul.f32 0.6931472, %v1293_v22  ;;  %v929_v32 = vsub.f32 %v925_v27, %v927_v25 }
 0x43e   : > { %v926_v31 = vadd.f32 %v924_v26, %v918_v24  ;;  %v931_v35 = vmul.f32 %v1153_v30, %v929_v32 }
 0x440   : > { %v930_v34 = vsub.f32 %v926_v31, %v928_v28  ;;  %933 = vst.msk [vmem:[%s1703_s6] sm:$0xff] %vm864_vm5, %v931_v35 }
 0x442   : > { %v932_v36 = vmul.f32 %v1154_v33, %v930_v34 }
 0x444   : > { %934 = vst.msk [vmem:[%s1703_s6 + $0x8] sm:$0xff] %vm864_vm5, %v932_v36 }
 0x445 PF: > { %946 = sbr.rel (!%p1408_p6) target bundleno = 1100 (0x44c), region = 75  ;;  %s1167_s18 = sshll.u32 (%p1408_p6), %s1324_s23, 4  ;;  %v965_v4 = vld [vmem:[%s1494_s19] sm:$0xff] (%p1408_p6)  ;;  %v967_v13 = vld [vmem:[%s1494_s19 + $0x8] sm:$0xff] (%p1408_p6)  ;;  %v969_v37 = vld [vmem:[%s1494_s19 + $0x10] sm:$0xff] (%p1408_p6) }
 0x446   : > { %s952_s21 = scalar_lea.vmem (%p1408_p6), %s1702_s5, %s1167_s18  ;;  %v971_v42 = vld [vmem:[%s1494_s19 + $0x18] sm:$0xff] (%p1408_p6) }
 0x447   : > { %966 = vst [vmem:[%s952_s21] sm:$0xff] (%p1408_p6), %v965_v4  ;;  %968 = vst [vmem:[%s952_s21 + $0x8] sm:$0xff] (%p1408_p6), %v967_v13 }
 0x448   : > { %970 = vst [vmem:[%s952_s21 + $0x20] sm:$0xff] (%p1408_p6), %v969_v37  ;;  %972 = vst [vmem:[%s952_s21 + $0x28] sm:$0xff] (%p1408_p6), %v971_v42 }
 0x44c PF: > { %s17_s25 = sadd.s32 1, %s1332_s25   ;;  %s1705_s21 = smov %s1320_s22 }
 0x44d   : > { %p14_p13 = scmp.ge.s32.totalorder %s17_s25, 4   ;;  %s1706_s22 = smov %s1413_s7 }
 0x44e   : > { %s1707_s23 = smov %s1328_s24  ;;  %s1708_s24 = smov %s1710_s26 }
 0x44f   :  { %16 = sbr.rel (!%p14_p13) target bundleno = 3 (0x3), region = 147 }

</bundles_post_ra>
